<compile_context>
chip_gen: v6e
topology: v6e:2x2x1
jax: 0.10.0
libtpu: 0.0.40
codegen_flags: <defaults>
</compile_context>

<pallas_src>
import numpy as np
import jax
import jax.numpy as jnp
from jax.experimental import pallas as pl
from jax.experimental.pallas import tpu as pltpu

TOTAL_CLASSES = 100

# ------------------------- fixed BaseNet / CIFAR geometry ------------------- #
C0, C1, C2 = 3, 6, 16        # channels: input, conv1, conv2
H1 = W1 = 32                 # input spatial size
KS = 5                       # conv kernel size
PW1 = 14                     # pooled conv1 width  (28 valid conv cols / 2)
GH1 = 16                     # pooled conv1 full-grid height (32/2; valid rows 14)
PW2 = 5                      # pooled conv2 width  (10 valid conv cols / 2)
GH2 = 8                      # pooled conv2 full-grid height (16/2; valid rows 5)
HID = TOTAL_CLASSES // 2     # 50
L_IN = W1 * C0               # 96  input lanes   (w,  ci)
L1 = PW1 * C1                # 84  stage-1 lanes (pw, co)
L2 = PW2 * C2                # 80  stage-2 lanes (pw, co)


# ------------------------------- Pallas kernel ------------------------------ #

def _basenet_kernel(x_ref, m1e_ref, m1o_ref, b1_ref,
                    m2e_ref, m2o_ref, b2_ref,
                    f1_ref, fb1_ref, w2_ref, fb2_ref,
                    out_ref,
                    a1_ref, p1_ref, a2_ref, p2_ref):
    """Fused BaseNet forward.  Activations: rows = (b, h), lanes = (w, c)."""
    B = out_ref.shape[0]
    r1 = B * H1      # conv1 output rows (b, oh)      -> 64 for B=2
    r1p = B * GH1    # pooled1 rows      (b, ph)      -> 32
    r2p = B * GH2    # pooled2 rows      (b, ph2)     -> 16

    # ---- stage 1: conv1 (5x5, 3->6) + bias + ReLU + 2x2/2 max-pool ----------
    acc_e = jnp.zeros((r1, L1), jnp.float32)
    acc_o = jnp.zeros((r1, L1), jnp.float32)
    for kh in range(KS):
        xs = x_ref[kh:kh + r1, :]                                  # (r1, 96)
        acc_e = acc_e + jnp.dot(xs, m1e_ref[kh],
                                preferred_element_type=jnp.float32)
        acc_o = acc_o + jnp.dot(xs, m1o_ref[kh],
                                preferred_element_type=jnp.float32)
    b1 = b1_ref[...]
    # width-direction pool is the max of the two precomputed phases
    a1_ref[...] = jnp.maximum(jnp.maximum(acc_e + b1, 0.0),
                              jnp.maximum(acc_o + b1, 0.0))        # (r1, 84)
    # height-direction pool: stride-2 row reads + max
    p1 = jnp.maximum(a1_ref[pl.ds(0, r1p, stride=2), :],
                     a1_ref[pl.ds(1, r1p, stride=2), :])           # (r1p, 84)
    p1_ref[0:r1p, :] = p1
    p1_ref[r1p:r1p + 8, :] = jnp.zeros((8, L1), jnp.float32)       # shift slack

    # ---- stage 2: conv2 (5x5, 6->16) + bias + ReLU + 2x2/2 max-pool ---------
    acc_e = jnp.zeros((r1p, L2), jnp.float32)
    acc_o = jnp.zeros((r1p, L2), jnp.float32)
    for kh in range(KS):
        xs = p1_ref[kh:kh + r1p, :]                                # (r1p, 84)
        acc_e = acc_e + jnp.dot(xs, m2e_ref[kh],
                                preferred_element_type=jnp.float32)
        acc_o = acc_o + jnp.dot(xs, m2o_ref[kh],
                                preferred_element_type=jnp.float32)
    b2 = b2_ref[...]
    a2_ref[...] = jnp.maximum(jnp.maximum(acc_e + b2, 0.0),
                              jnp.maximum(acc_o + b2, 0.0))        # (r1p, 80)
    p2 = jnp.maximum(a2_ref[pl.ds(0, r2p, stride=2), :],
                     a2_ref[pl.ds(1, r2p, stride=2), :])           # (r2p, 80)
    p2_ref[0:r2p, :] = p2
    p2_ref[r2p:r2p + 8, :] = jnp.zeros((8, L2), jnp.float32)

    # ---- stage 3: fc1(400->50)+ReLU, fc2(50->100) ---------------------------
    # fc1 is applied as 5 row-shifted matmuls (one per 5x5-block row); the real
    # per-sample result lands at row b*GH2.
    h = jnp.zeros((r2p, HID), jnp.float32)
    for ph in range(KS):
        h = h + jnp.dot(p2_ref[ph:ph + r2p, :], f1_ref[ph],
                        preferred_element_type=jnp.float32)
    h = jnp.maximum(h + fb1_ref[...], 0.0)
    logits = jnp.dot(h, w2_ref[...],
                     preferred_element_type=jnp.float32) + fb2_ref[...]
    for bi in range(B):
        out_ref[bi:bi + 1, :] = logits[bi * GH2:bi * GH2 + 1, :]


# --------------------------- one-time parameter prep ------------------------ #

def _conv_pool_mats(w, in_width, pool_width):
    """Block matrices applying one conv row (fixed kh) across the width dim AND
    selecting the even/odd width-phase of the following 2x2 max-pool.

    out_phase[(b,oh),(pw,co)] = sum_kh  X[(b,oh+kh), :] @ m_phase[kh]
                              = conv(x)[b, co, oh, 2*pw + phase]
    """
    cout, cin, _, _ = w.shape
    me = np.zeros((KS, in_width * cin, pool_width * cout), np.float32)
    mo = np.zeros_like(me)
    for kh in range(KS):
        for pw in range(pool_width):
            for kw in range(KS):
                blk = w[:, :, kh, kw].T                 # (cin, cout)
                we = 2 * pw + kw                        # input col, even phase
                wo = we + 1                             # input col, odd phase
                me[kh, we * cin:(we + 1) * cin, pw * cout:(pw + 1) * cout] = blk
                mo[kh, wo * cin:(wo + 1) * cin, pw * cout:(pw + 1) * cout] = blk
    return me, mo


def prepare_params(params):
    """Repack PyTorch-layout params into kernel operands (runs once, off the
    per-forward path: all transposes / flatten permutations folded here)."""
    w1, b1, w2, b2, fw1, fb1, fw2, fb2 = [np.asarray(p, np.float32) for p in params]
    m1e, m1o = _conv_pool_mats(w1, W1, PW1)                 # (5, 96, 84)
    m2e, m2o = _conv_pool_mats(w2, PW1, PW2)                # (5, 84, 80)
    b1t = np.tile(b1, PW1).reshape(1, L1)                   # bias per (pw, co)
    b2t = np.tile(b2, PW2).reshape(1, L2)
    # fc1: fold PyTorch's NCHW view(-1, 400) permutation + transpose into the
    # weight, split by the 5 rows of the 5x5 block: f1[ph, pw*16 + c, j].
    f1 = np.ascontiguousarray(
        np.transpose(fw1.reshape(HID, C2, KS, KS), (2, 3, 1, 0)).reshape(KS, L2, HID))
    fb1r = fb1.reshape(1, HID)
    w2t = np.ascontiguousarray(fw2.T)                       # (50, 100)
    fb2r = fb2.reshape(1, TOTAL_CLASSES)
    return tuple(jnp.asarray(a) for a in
                 (m1e, m1o, b1t, m2e, m2o, b2t, f1, fb1r, w2t, fb2r))


# -------------------------------- forward ----------------------------------- #

def basenet_forward(x_nchw, kparams):
    """Fused BaseNet forward: x (B, 3, 32, 32) NCHW -> logits (B, 100)."""
    m1e, m1o, b1t, m2e, m2o, b2t, f1, fb1r, w2t, fb2r = kparams
    B = x_nchw.shape[0]
    # Interface glue (tiny): NCHW -> rows (b, h) x lanes (w, c); +8 zero rows so
    # the 5 row-shifted reads in the kernel stay in bounds.
    x_rows = jnp.transpose(x_nchw, (0, 2, 3, 1)).reshape(B * H1, L_IN)
    x_rows = jnp.pad(x_rows.astype(jnp.float32), ((0, 8), (0, 0)))
    inputs = (x_rows, m1e, m1o, b1t, m2e, m2o, b2t, f1, fb1r, w2t, fb2r)

    def full_spec(a):
        nd = a.ndim
        return pl.BlockSpec(a.shape, lambda i, _nd=nd: (0,) * _nd)

    return pl.pallas_call(
        _basenet_kernel,
        out_shape=jax.ShapeDtypeStruct((B, TOTAL_CLASSES), jnp.float32),
        grid=(1,),   # whole net in one step; for large batches grid the B*H row
                     # axis with "parallel" semantics instead.
        in_specs=[full_spec(a) for a in inputs],
        out_specs=pl.BlockSpec((B, TOTAL_CLASSES), lambda i: (0, 0)),
        scratch_shapes=[
            pltpu.VMEM((B * H1, L1), jnp.float32),        # conv1 (w-pooled) rows
            pltpu.VMEM((B * GH1 + 8, L1), jnp.float32),   # pooled1 (+zero tail)
            pltpu.VMEM((B * GH1, L2), jnp.float32),       # conv2 (w-pooled) rows
            pltpu.VMEM((B * GH2 + 8, L2), jnp.float32),   # pooled2 (+zero tail)
        ],
        compiler_params=pltpu.CompilerParams(
            dimension_semantics=("arbitrary",)),
    )(*inputs)


# -------------------------- deterministic parameters ------------------------ #

def init_params(key):
    """PyTorch-style default init (uniform +-1/sqrt(fan_in)), deterministic."""
    def uni(k, shape, fan_in):
        bound = 1.0 / (fan_in ** 0.5)
        return jax.random.uniform(k, shape, jnp.float32, -bound, bound)

    ks = jax.random.split(key, 8)
    w1 = uni(ks[0], (C1, C0, KS, KS), C0 * KS * KS)
    b1 = uni(ks[1], (C1,), C0 * KS * KS)
    w2 = uni(ks[2], (C2, C1, KS, KS), C1 * KS * KS)
    b2 = uni(ks[3], (C2,), C1 * KS * KS)
    fw1 = uni(ks[4], (HID, C2 * KS * KS), C2 * KS * KS)
    fb1 = uni(ks[5], (HID,), C2 * KS * KS)
    fw2 = uni(ks[6], (TOTAL_CLASSES, HID), HID)
    fb2 = uni(ks[7], (TOTAL_CLASSES,), HID)
    return (w1, b1, w2, b2, fw1, fb1, fw2, fb2)


# ------------------------------ pure-JAX reference -------------------------- #

def reference_forward(x, params):
    (w1, b1, w2, b2, fw1, fb1, fw2, fb2) = params
    dn = ('NCHW', 'OIHW', 'NCHW')
    hp = jax.lax.Precision.HIGHEST

    y = jax.lax.conv_general_dilated(x, w1, (1, 1), 'VALID',
                                     dimension_numbers=dn, precision=hp)
    y = jax.nn.relu(y + b1[None, :, None, None])
    y = jax.lax.reduce_window(y, -jnp.inf, jax.lax.max,
                              (1, 1, 2, 2), (1, 1, 2, 2), 'VALID')
    z = jax.lax.conv_general_dilated(y, w2, (1, 1), 'VALID',
                                     dimension_numbers=dn, precision=hp)
    z = jax.nn.relu(z + b2[None, :, None, None])
    z = jax.lax.reduce_window(z, -jnp.inf, jax.lax.max,
                              (1, 1, 2, 2), (1, 1, 2, 2), 'VALID')
    flat = z.reshape(z.shape[0], -1)
    h = jax.nn.relu(flat @ fw1.T + fb1)
    return h @ fw2.T + fb2


# ---------------------------------- main ------------------------------------ #

if __name__ == "__main__":
    key = jax.random.PRNGKey(0)
    pkey, xkey = jax.random.split(key)
    params = init_params(pkey)
    # CIFAR-sized input is required by the module's view(-1, 16*5*5); batch=2.
    x = jax.random.normal(xkey, (2, 3, 32, 32), jnp.float32)

    kparams = prepare_params(params)          # one-time weight repack
    fwd = jax.jit(basenet_forward)
    out = jax.block_until_ready(fwd(x, kparams))
    assert out.shape == (2, TOTAL_CLASSES) and out.dtype == jnp.float32

    ref = reference_forward(x, params)
    max_err = float(jnp.max(jnp.abs(out - ref)))
    assert jnp.allclose(out, ref, atol=1e-2, rtol=1e-2), max_err

    print("KERNEL_OK")
</pallas_src>

<mosaic_0001>
module attributes {stable_mosaic.version = 11 : i64} {
  func.func @_basenet_kernel(%arg0: i32, %arg1: memref<72x96xf32, #tpu.memory_space<vmem>>, %arg2: memref<5x96x84xf32, #tpu.memory_space<vmem>>, %arg3: memref<5x96x84xf32, #tpu.memory_space<vmem>>, %arg4: memref<1x84xf32, #tpu.memory_space<vmem>>, %arg5: memref<5x84x80xf32, #tpu.memory_space<vmem>>, %arg6: memref<5x84x80xf32, #tpu.memory_space<vmem>>, %arg7: memref<1x80xf32, #tpu.memory_space<vmem>>, %arg8: memref<5x80x50xf32, #tpu.memory_space<vmem>>, %arg9: memref<1x50xf32, #tpu.memory_space<vmem>>, %arg10: memref<50x100xf32, #tpu.memory_space<vmem>>, %arg11: memref<1x100xf32, #tpu.memory_space<vmem>>, %arg12: memref<2x100xf32, #tpu.memory_space<vmem>>, %arg13: memref<64x84xf32, #tpu.memory_space<vmem>>, %arg14: memref<40x84xf32, #tpu.memory_space<vmem>>, %arg15: memref<32x80xf32, #tpu.memory_space<vmem>>, %arg16: memref<24x80xf32, #tpu.memory_space<vmem>>) attributes {dimension_semantics = [#tpu.dimension_semantics<arbitrary>], iteration_bounds = array<i64: 1>, scalar_prefetch = 0 : i64, scratch_operands = 4 : i64, tpu.core_type = #tpu.core_type<tc>, window_params = [{pipeline_mode = #tpu.pipeline_mode<synchronous>, transform_indices = @transform_0, window_bounds = array<i64: 72, 96>}, {pipeline_mode = #tpu.pipeline_mode<synchronous>, transform_indices = @transform_1, window_bounds = array<i64: 5, 96, 84>}, {pipeline_mode = #tpu.pipeline_mode<synchronous>, transform_indices = @transform_2, window_bounds = array<i64: 5, 96, 84>}, {pipeline_mode = #tpu.pipeline_mode<synchronous>, transform_indices = @transform_3, window_bounds = array<i64: 1, 84>}, {pipeline_mode = #tpu.pipeline_mode<synchronous>, transform_indices = @transform_4, window_bounds = array<i64: 5, 84, 80>}, {pipeline_mode = #tpu.pipeline_mode<synchronous>, transform_indices = @transform_5, window_bounds = array<i64: 5, 84, 80>}, {pipeline_mode = #tpu.pipeline_mode<synchronous>, transform_indices = @transform_6, window_bounds = array<i64: 1, 80>}, {pipeline_mode = #tpu.pipeline_mode<synchronous>, transform_indices = @transform_7, window_bounds = array<i64: 5, 80, 50>}, {pipeline_mode = #tpu.pipeline_mode<synchronous>, transform_indices = @transform_8, window_bounds = array<i64: 1, 50>}, {pipeline_mode = #tpu.pipeline_mode<synchronous>, transform_indices = @transform_9, window_bounds = array<i64: 50, 100>}, {pipeline_mode = #tpu.pipeline_mode<synchronous>, transform_indices = @transform_10, window_bounds = array<i64: 1, 100>}, {pipeline_mode = #tpu.pipeline_mode<synchronous>, transform_indices = @transform_11, window_bounds = array<i64: 2, 100>}]} {
    %cst = arith.constant 0.000000e+00 : f32
    %0 = vector.broadcast %cst : f32 to vector<64x84xf32>
    %cst_0 = arith.constant 0.000000e+00 : f32
    %1 = vector.broadcast %cst_0 : f32 to vector<64x84xf32>
    %c0 = arith.constant 0 : index
    %c0_1 = arith.constant 0 : index
    %2 = vector.load %arg1[%c0, %c0_1] : memref<72x96xf32, #tpu.memory_space<vmem>>, vector<64x96xf32>
    %c0_2 = arith.constant 0 : index
    %c0_3 = arith.constant 0 : index
    %c0_4 = arith.constant 0 : index
    %3 = vector.load %arg2[%c0_2, %c0_3, %c0_4] : memref<5x96x84xf32, #tpu.memory_space<vmem>>, vector<1x96x84xf32>
    %4 = vector.shape_cast %3 : vector<1x96x84xf32> to vector<96x84xf32>
    %cst_5 = arith.constant dense<0.000000e+00> : vector<64x84xf32>
    %5 = tpu.matmul %2, %4, %cst_5 {dimension_numbers = #tpu.dot_dimension_numbers<[1], [0], [0], [1], [0, 0, 1, 1], [], []>} : vector<64x96xf32>, vector<96x84xf32>, vector<64x84xf32> -> vector<64x84xf32>
    %6 = arith.addf %0, %5 : vector<64x84xf32>
    %c0_6 = arith.constant 0 : index
    %c0_7 = arith.constant 0 : index
    %c0_8 = arith.constant 0 : index
    %7 = vector.load %arg3[%c0_6, %c0_7, %c0_8] : memref<5x96x84xf32, #tpu.memory_space<vmem>>, vector<1x96x84xf32>
    %8 = vector.shape_cast %7 : vector<1x96x84xf32> to vector<96x84xf32>
    %cst_9 = arith.constant dense<0.000000e+00> : vector<64x84xf32>
    %9 = tpu.matmul %2, %8, %cst_9 {dimension_numbers = #tpu.dot_dimension_numbers<[1], [0], [0], [1], [0, 0, 1, 1], [], []>} : vector<64x96xf32>, vector<96x84xf32>, vector<64x84xf32> -> vector<64x84xf32>
    %10 = arith.addf %1, %9 : vector<64x84xf32>
    %c1 = arith.constant 1 : index
    %c0_10 = arith.constant 0 : index
    %11 = vector.load %arg1[%c1, %c0_10] : memref<72x96xf32, #tpu.memory_space<vmem>>, vector<64x96xf32>
    %c1_11 = arith.constant 1 : index
    %c0_12 = arith.constant 0 : index
    %c0_13 = arith.constant 0 : index
    %12 = vector.load %arg2[%c1_11, %c0_12, %c0_13] : memref<5x96x84xf32, #tpu.memory_space<vmem>>, vector<1x96x84xf32>
    %13 = vector.shape_cast %12 : vector<1x96x84xf32> to vector<96x84xf32>
    %cst_14 = arith.constant dense<0.000000e+00> : vector<64x84xf32>
    %14 = tpu.matmul %11, %13, %cst_14 {dimension_numbers = #tpu.dot_dimension_numbers<[1], [0], [0], [1], [0, 0, 1, 1], [], []>} : vector<64x96xf32>, vector<96x84xf32>, vector<64x84xf32> -> vector<64x84xf32>
    %15 = arith.addf %6, %14 : vector<64x84xf32>
    %c1_15 = arith.constant 1 : index
    %c0_16 = arith.constant 0 : index
    %c0_17 = arith.constant 0 : index
    %16 = vector.load %arg3[%c1_15, %c0_16, %c0_17] : memref<5x96x84xf32, #tpu.memory_space<vmem>>, vector<1x96x84xf32>
    %17 = vector.shape_cast %16 : vector<1x96x84xf32> to vector<96x84xf32>
    %cst_18 = arith.constant dense<0.000000e+00> : vector<64x84xf32>
    %18 = tpu.matmul %11, %17, %cst_18 {dimension_numbers = #tpu.dot_dimension_numbers<[1], [0], [0], [1], [0, 0, 1, 1], [], []>} : vector<64x96xf32>, vector<96x84xf32>, vector<64x84xf32> -> vector<64x84xf32>
    %19 = arith.addf %10, %18 : vector<64x84xf32>
    %c2 = arith.constant 2 : index
    %c0_19 = arith.constant 0 : index
    %20 = vector.load %arg1[%c2, %c0_19] : memref<72x96xf32, #tpu.memory_space<vmem>>, vector<64x96xf32>
    %c2_20 = arith.constant 2 : index
    %c0_21 = arith.constant 0 : index
    %c0_22 = arith.constant 0 : index
    %21 = vector.load %arg2[%c2_20, %c0_21, %c0_22] : memref<5x96x84xf32, #tpu.memory_space<vmem>>, vector<1x96x84xf32>
    %22 = vector.shape_cast %21 : vector<1x96x84xf32> to vector<96x84xf32>
    %cst_23 = arith.constant dense<0.000000e+00> : vector<64x84xf32>
    %23 = tpu.matmul %20, %22, %cst_23 {dimension_numbers = #tpu.dot_dimension_numbers<[1], [0], [0], [1], [0, 0, 1, 1], [], []>} : vector<64x96xf32>, vector<96x84xf32>, vector<64x84xf32> -> vector<64x84xf32>
    %24 = arith.addf %15, %23 : vector<64x84xf32>
    %c2_24 = arith.constant 2 : index
    %c0_25 = arith.constant 0 : index
    %c0_26 = arith.constant 0 : index
    %25 = vector.load %arg3[%c2_24, %c0_25, %c0_26] : memref<5x96x84xf32, #tpu.memory_space<vmem>>, vector<1x96x84xf32>
    %26 = vector.shape_cast %25 : vector<1x96x84xf32> to vector<96x84xf32>
    %cst_27 = arith.constant dense<0.000000e+00> : vector<64x84xf32>
    %27 = tpu.matmul %20, %26, %cst_27 {dimension_numbers = #tpu.dot_dimension_numbers<[1], [0], [0], [1], [0, 0, 1, 1], [], []>} : vector<64x96xf32>, vector<96x84xf32>, vector<64x84xf32> -> vector<64x84xf32>
    %28 = arith.addf %19, %27 : vector<64x84xf32>
    %c3 = arith.constant 3 : index
    %c0_28 = arith.constant 0 : index
    %29 = vector.load %arg1[%c3, %c0_28] : memref<72x96xf32, #tpu.memory_space<vmem>>, vector<64x96xf32>
    %c3_29 = arith.constant 3 : index
    %c0_30 = arith.constant 0 : index
    %c0_31 = arith.constant 0 : index
    %30 = vector.load %arg2[%c3_29, %c0_30, %c0_31] : memref<5x96x84xf32, #tpu.memory_space<vmem>>, vector<1x96x84xf32>
    %31 = vector.shape_cast %30 : vector<1x96x84xf32> to vector<96x84xf32>
    %cst_32 = arith.constant dense<0.000000e+00> : vector<64x84xf32>
    %32 = tpu.matmul %29, %31, %cst_32 {dimension_numbers = #tpu.dot_dimension_numbers<[1], [0], [0], [1], [0, 0, 1, 1], [], []>} : vector<64x96xf32>, vector<96x84xf32>, vector<64x84xf32> -> vector<64x84xf32>
    %33 = arith.addf %24, %32 : vector<64x84xf32>
    %c3_33 = arith.constant 3 : index
    %c0_34 = arith.constant 0 : index
    %c0_35 = arith.constant 0 : index
    %34 = vector.load %arg3[%c3_33, %c0_34, %c0_35] : memref<5x96x84xf32, #tpu.memory_space<vmem>>, vector<1x96x84xf32>
    %35 = vector.shape_cast %34 : vector<1x96x84xf32> to vector<96x84xf32>
    %cst_36 = arith.constant dense<0.000000e+00> : vector<64x84xf32>
    %36 = tpu.matmul %29, %35, %cst_36 {dimension_numbers = #tpu.dot_dimension_numbers<[1], [0], [0], [1], [0, 0, 1, 1], [], []>} : vector<64x96xf32>, vector<96x84xf32>, vector<64x84xf32> -> vector<64x84xf32>
    %37 = arith.addf %28, %36 : vector<64x84xf32>
    %c4 = arith.constant 4 : index
    %c0_37 = arith.constant 0 : index
    %38 = vector.load %arg1[%c4, %c0_37] : memref<72x96xf32, #tpu.memory_space<vmem>>, vector<64x96xf32>
    %c4_38 = arith.constant 4 : index
    %c0_39 = arith.constant 0 : index
    %c0_40 = arith.constant 0 : index
    %39 = vector.load %arg2[%c4_38, %c0_39, %c0_40] : memref<5x96x84xf32, #tpu.memory_space<vmem>>, vector<1x96x84xf32>
    %40 = vector.shape_cast %39 : vector<1x96x84xf32> to vector<96x84xf32>
    %cst_41 = arith.constant dense<0.000000e+00> : vector<64x84xf32>
    %41 = tpu.matmul %38, %40, %cst_41 {dimension_numbers = #tpu.dot_dimension_numbers<[1], [0], [0], [1], [0, 0, 1, 1], [], []>} : vector<64x96xf32>, vector<96x84xf32>, vector<64x84xf32> -> vector<64x84xf32>
    %42 = arith.addf %33, %41 : vector<64x84xf32>
    %c4_42 = arith.constant 4 : index
    %c0_43 = arith.constant 0 : index
    %c0_44 = arith.constant 0 : index
    %43 = vector.load %arg3[%c4_42, %c0_43, %c0_44] : memref<5x96x84xf32, #tpu.memory_space<vmem>>, vector<1x96x84xf32>
    %44 = vector.shape_cast %43 : vector<1x96x84xf32> to vector<96x84xf32>
    %cst_45 = arith.constant dense<0.000000e+00> : vector<64x84xf32>
    %45 = tpu.matmul %38, %44, %cst_45 {dimension_numbers = #tpu.dot_dimension_numbers<[1], [0], [0], [1], [0, 0, 1, 1], [], []>} : vector<64x96xf32>, vector<96x84xf32>, vector<64x84xf32> -> vector<64x84xf32>
    %46 = arith.addf %37, %45 : vector<64x84xf32>
    %c0_46 = arith.constant 0 : index
    %c0_47 = arith.constant 0 : index
    %47 = vector.load %arg4[%c0_46, %c0_47] : memref<1x84xf32, #tpu.memory_space<vmem>>, vector<1x84xf32>
    %48 = vector.broadcast %47 : vector<1x84xf32> to vector<64x84xf32>
    %49 = arith.addf %42, %48 : vector<64x84xf32>
    %cst_48 = arith.constant 0.000000e+00 : f32
    %50 = vector.broadcast %cst_48 : f32 to vector<64x84xf32>
    %51 = arith.maximumf %49, %50 : vector<64x84xf32>
    %52 = vector.broadcast %47 : vector<1x84xf32> to vector<64x84xf32>
    %53 = arith.addf %46, %52 : vector<64x84xf32>
    %cst_49 = arith.constant 0.000000e+00 : f32
    %54 = vector.broadcast %cst_49 : f32 to vector<64x84xf32>
    %55 = arith.maximumf %53, %54 : vector<64x84xf32>
    %56 = arith.maximumf %51, %55 : vector<64x84xf32>
    %c0_50 = arith.constant 0 : index
    %c0_51 = arith.constant 0 : index
    %57 = vector.load %arg13[%c0_50, %c0_51] : memref<64x84xf32, #tpu.memory_space<vmem>>, vector<64x84xf32>
    tpu.vector_store %arg13[%c0_50, %c0_51], %56 {strides = array<i32>} : memref<64x84xf32, #tpu.memory_space<vmem>>, vector<64x84xf32>,
    %c0_52 = arith.constant 0 : index
    %c0_53 = arith.constant 0 : index
    %58 = tpu.strided_load %arg13[%c0_52, %c0_53] {strides = array<i32: 2, 1>} : memref<64x84xf32, #tpu.memory_space<vmem>>, vector<32x84xf32>
    %c1_54 = arith.constant 1 : index
    %c0_55 = arith.constant 0 : index
    %59 = tpu.strided_load %arg13[%c1_54, %c0_55] {strides = array<i32: 2, 1>} : memref<64x84xf32, #tpu.memory_space<vmem>>, vector<32x84xf32>
    %60 = arith.maximumf %58, %59 : vector<32x84xf32>
    %c0_56 = arith.constant 0 : index
    %c0_57 = arith.constant 0 : index
    %61 = vector.load %arg14[%c0_56, %c0_57] : memref<40x84xf32, #tpu.memory_space<vmem>>, vector<32x84xf32>
    tpu.vector_store %arg14[%c0_56, %c0_57], %60 {strides = array<i32>} : memref<40x84xf32, #tpu.memory_space<vmem>>, vector<32x84xf32>,
    %cst_58 = arith.constant 0.000000e+00 : f32
    %62 = vector.broadcast %cst_58 : f32 to vector<8x84xf32>
    %c32 = arith.constant 32 : index
    %c0_59 = arith.constant 0 : index
    %63 = vector.load %arg14[%c32, %c0_59] : memref<40x84xf32, #tpu.memory_space<vmem>>, vector<8x84xf32>
    tpu.vector_store %arg14[%c32, %c0_59], %62 {strides = array<i32>} : memref<40x84xf32, #tpu.memory_space<vmem>>, vector<8x84xf32>,
    %cst_60 = arith.constant 0.000000e+00 : f32
    %64 = vector.broadcast %cst_60 : f32 to vector<32x80xf32>
    %cst_61 = arith.constant 0.000000e+00 : f32
    %65 = vector.broadcast %cst_61 : f32 to vector<32x80xf32>
    %c0_62 = arith.constant 0 : index
    %c0_63 = arith.constant 0 : index
    %66 = vector.load %arg14[%c0_62, %c0_63] : memref<40x84xf32, #tpu.memory_space<vmem>>, vector<32x84xf32>
    %c0_64 = arith.constant 0 : index
    %c0_65 = arith.constant 0 : index
    %c0_66 = arith.constant 0 : index
    %67 = vector.load %arg5[%c0_64, %c0_65, %c0_66] : memref<5x84x80xf32, #tpu.memory_space<vmem>>, vector<1x84x80xf32>
    %68 = vector.shape_cast %67 : vector<1x84x80xf32> to vector<84x80xf32>
    %cst_67 = arith.constant dense<0.000000e+00> : vector<32x80xf32>
    %69 = tpu.matmul %66, %68, %cst_67 {dimension_numbers = #tpu.dot_dimension_numbers<[1], [0], [0], [1], [0, 0, 1, 1], [], []>} : vector<32x84xf32>, vector<84x80xf32>, vector<32x80xf32> -> vector<32x80xf32>
    %70 = arith.addf %64, %69 : vector<32x80xf32>
    %c0_68 = arith.constant 0 : index
    %c0_69 = arith.constant 0 : index
    %c0_70 = arith.constant 0 : index
    %71 = vector.load %arg6[%c0_68, %c0_69, %c0_70] : memref<5x84x80xf32, #tpu.memory_space<vmem>>, vector<1x84x80xf32>
    %72 = vector.shape_cast %71 : vector<1x84x80xf32> to vector<84x80xf32>
    %cst_71 = arith.constant dense<0.000000e+00> : vector<32x80xf32>
    %73 = tpu.matmul %66, %72, %cst_71 {dimension_numbers = #tpu.dot_dimension_numbers<[1], [0], [0], [1], [0, 0, 1, 1], [], []>} : vector<32x84xf32>, vector<84x80xf32>, vector<32x80xf32> -> vector<32x80xf32>
    %74 = arith.addf %65, %73 : vector<32x80xf32>
    %c1_72 = arith.constant 1 : index
    %c0_73 = arith.constant 0 : index
    %75 = vector.load %arg14[%c1_72, %c0_73] : memref<40x84xf32, #tpu.memory_space<vmem>>, vector<32x84xf32>
    %c1_74 = arith.constant 1 : index
    %c0_75 = arith.constant 0 : index
    %c0_76 = arith.constant 0 : index
    %76 = vector.load %arg5[%c1_74, %c0_75, %c0_76] : memref<5x84x80xf32, #tpu.memory_space<vmem>>, vector<1x84x80xf32>
    %77 = vector.shape_cast %76 : vector<1x84x80xf32> to vector<84x80xf32>
    %cst_77 = arith.constant dense<0.000000e+00> : vector<32x80xf32>
    %78 = tpu.matmul %75, %77, %cst_77 {dimension_numbers = #tpu.dot_dimension_numbers<[1], [0], [0], [1], [0, 0, 1, 1], [], []>} : vector<32x84xf32>, vector<84x80xf32>, vector<32x80xf32> -> vector<32x80xf32>
    %79 = arith.addf %70, %78 : vector<32x80xf32>
    %c1_78 = arith.constant 1 : index
    %c0_79 = arith.constant 0 : index
    %c0_80 = arith.constant 0 : index
    %80 = vector.load %arg6[%c1_78, %c0_79, %c0_80] : memref<5x84x80xf32, #tpu.memory_space<vmem>>, vector<1x84x80xf32>
    %81 = vector.shape_cast %80 : vector<1x84x80xf32> to vector<84x80xf32>
    %cst_81 = arith.constant dense<0.000000e+00> : vector<32x80xf32>
    %82 = tpu.matmul %75, %81, %cst_81 {dimension_numbers = #tpu.dot_dimension_numbers<[1], [0], [0], [1], [0, 0, 1, 1], [], []>} : vector<32x84xf32>, vector<84x80xf32>, vector<32x80xf32> -> vector<32x80xf32>
    %83 = arith.addf %74, %82 : vector<32x80xf32>
    %c2_82 = arith.constant 2 : index
    %c0_83 = arith.constant 0 : index
    %84 = vector.load %arg14[%c2_82, %c0_83] : memref<40x84xf32, #tpu.memory_space<vmem>>, vector<32x84xf32>
    %c2_84 = arith.constant 2 : index
    %c0_85 = arith.constant 0 : index
    %c0_86 = arith.constant 0 : index
    %85 = vector.load %arg5[%c2_84, %c0_85, %c0_86] : memref<5x84x80xf32, #tpu.memory_space<vmem>>, vector<1x84x80xf32>
    %86 = vector.shape_cast %85 : vector<1x84x80xf32> to vector<84x80xf32>
    %cst_87 = arith.constant dense<0.000000e+00> : vector<32x80xf32>
    %87 = tpu.matmul %84, %86, %cst_87 {dimension_numbers = #tpu.dot_dimension_numbers<[1], [0], [0], [1], [0, 0, 1, 1], [], []>} : vector<32x84xf32>, vector<84x80xf32>, vector<32x80xf32> -> vector<32x80xf32>
    %88 = arith.addf %79, %87 : vector<32x80xf32>
    %c2_88 = arith.constant 2 : index
    %c0_89 = arith.constant 0 : index
    %c0_90 = arith.constant 0 : index
    %89 = vector.load %arg6[%c2_88, %c0_89, %c0_90] : memref<5x84x80xf32, #tpu.memory_space<vmem>>, vector<1x84x80xf32>
    %90 = vector.shape_cast %89 : vector<1x84x80xf32> to vector<84x80xf32>
    %cst_91 = arith.constant dense<0.000000e+00> : vector<32x80xf32>
    %91 = tpu.matmul %84, %90, %cst_91 {dimension_numbers = #tpu.dot_dimension_numbers<[1], [0], [0], [1], [0, 0, 1, 1], [], []>} : vector<32x84xf32>, vector<84x80xf32>, vector<32x80xf32> -> vector<32x80xf32>
    %92 = arith.addf %83, %91 : vector<32x80xf32>
    %c3_92 = arith.constant 3 : index
    %c0_93 = arith.constant 0 : index
    %93 = vector.load %arg14[%c3_92, %c0_93] : memref<40x84xf32, #tpu.memory_space<vmem>>, vector<32x84xf32>
    %c3_94 = arith.constant 3 : index
    %c0_95 = arith.constant 0 : index
    %c0_96 = arith.constant 0 : index
    %94 = vector.load %arg5[%c3_94, %c0_95, %c0_96] : memref<5x84x80xf32, #tpu.memory_space<vmem>>, vector<1x84x80xf32>
    %95 = vector.shape_cast %94 : vector<1x84x80xf32> to vector<84x80xf32>
    %cst_97 = arith.constant dense<0.000000e+00> : vector<32x80xf32>
    %96 = tpu.matmul %93, %95, %cst_97 {dimension_numbers = #tpu.dot_dimension_numbers<[1], [0], [0], [1], [0, 0, 1, 1], [], []>} : vector<32x84xf32>, vector<84x80xf32>, vector<32x80xf32> -> vector<32x80xf32>
    %97 = arith.addf %88, %96 : vector<32x80xf32>
    %c3_98 = arith.constant 3 : index
    %c0_99 = arith.constant 0 : index
    %c0_100 = arith.constant 0 : index
    %98 = vector.load %arg6[%c3_98, %c0_99, %c0_100] : memref<5x84x80xf32, #tpu.memory_space<vmem>>, vector<1x84x80xf32>
    %99 = vector.shape_cast %98 : vector<1x84x80xf32> to vector<84x80xf32>
    %cst_101 = arith.constant dense<0.000000e+00> : vector<32x80xf32>
    %100 = tpu.matmul %93, %99, %cst_101 {dimension_numbers = #tpu.dot_dimension_numbers<[1], [0], [0], [1], [0, 0, 1, 1], [], []>} : vector<32x84xf32>, vector<84x80xf32>, vector<32x80xf32> -> vector<32x80xf32>
    %101 = arith.addf %92, %100 : vector<32x80xf32>
    %c4_102 = arith.constant 4 : index
    %c0_103 = arith.constant 0 : index
    %102 = vector.load %arg14[%c4_102, %c0_103] : memref<40x84xf32, #tpu.memory_space<vmem>>, vector<32x84xf32>
    %c4_104 = arith.constant 4 : index
    %c0_105 = arith.constant 0 : index
    %c0_106 = arith.constant 0 : index
    %103 = vector.load %arg5[%c4_104, %c0_105, %c0_106] : memref<5x84x80xf32, #tpu.memory_space<vmem>>, vector<1x84x80xf32>
    %104 = vector.shape_cast %103 : vector<1x84x80xf32> to vector<84x80xf32>
    %cst_107 = arith.constant dense<0.000000e+00> : vector<32x80xf32>
    %105 = tpu.matmul %102, %104, %cst_107 {dimension_numbers = #tpu.dot_dimension_numbers<[1], [0], [0], [1], [0, 0, 1, 1], [], []>} : vector<32x84xf32>, vector<84x80xf32>, vector<32x80xf32> -> vector<32x80xf32>
    %106 = arith.addf %97, %105 : vector<32x80xf32>
    %c4_108 = arith.constant 4 : index
    %c0_109 = arith.constant 0 : index
    %c0_110 = arith.constant 0 : index
    %107 = vector.load %arg6[%c4_108, %c0_109, %c0_110] : memref<5x84x80xf32, #tpu.memory_space<vmem>>, vector<1x84x80xf32>
    %108 = vector.shape_cast %107 : vector<1x84x80xf32> to vector<84x80xf32>
    %cst_111 = arith.constant dense<0.000000e+00> : vector<32x80xf32>
    %109 = tpu.matmul %102, %108, %cst_111 {dimension_numbers = #tpu.dot_dimension_numbers<[1], [0], [0], [1], [0, 0, 1, 1], [], []>} : vector<32x84xf32>, vector<84x80xf32>, vector<32x80xf32> -> vector<32x80xf32>
    %110 = arith.addf %101, %109 : vector<32x80xf32>
    %c0_112 = arith.constant 0 : index
    %c0_113 = arith.constant 0 : index
    %111 = vector.load %arg7[%c0_112, %c0_113] : memref<1x80xf32, #tpu.memory_space<vmem>>, vector<1x80xf32>
    %112 = vector.broadcast %111 : vector<1x80xf32> to vector<32x80xf32>
    %113 = arith.addf %106, %112 : vector<32x80xf32>
    %cst_114 = arith.constant 0.000000e+00 : f32
    %114 = vector.broadcast %cst_114 : f32 to vector<32x80xf32>
    %115 = arith.maximumf %113, %114 : vector<32x80xf32>
    %116 = vector.broadcast %111 : vector<1x80xf32> to vector<32x80xf32>
    %117 = arith.addf %110, %116 : vector<32x80xf32>
    %cst_115 = arith.constant 0.000000e+00 : f32
    %118 = vector.broadcast %cst_115 : f32 to vector<32x80xf32>
    %119 = arith.maximumf %117, %118 : vector<32x80xf32>
    %120 = arith.maximumf %115, %119 : vector<32x80xf32>
    %c0_116 = arith.constant 0 : index
    %c0_117 = arith.constant 0 : index
    %121 = vector.load %arg15[%c0_116, %c0_117] : memref<32x80xf32, #tpu.memory_space<vmem>>, vector<32x80xf32>
    tpu.vector_store %arg15[%c0_116, %c0_117], %120 {strides = array<i32>} : memref<32x80xf32, #tpu.memory_space<vmem>>, vector<32x80xf32>,
    %c0_118 = arith.constant 0 : index
    %c0_119 = arith.constant 0 : index
    %122 = tpu.strided_load %arg15[%c0_118, %c0_119] {strides = array<i32: 2, 1>} : memref<32x80xf32, #tpu.memory_space<vmem>>, vector<16x80xf32>
    %c1_120 = arith.constant 1 : index
    %c0_121 = arith.constant 0 : index
    %123 = tpu.strided_load %arg15[%c1_120, %c0_121] {strides = array<i32: 2, 1>} : memref<32x80xf32, #tpu.memory_space<vmem>>, vector<16x80xf32>
    %124 = arith.maximumf %122, %123 : vector<16x80xf32>
    %c0_122 = arith.constant 0 : index
    %c0_123 = arith.constant 0 : index
    %125 = vector.load %arg16[%c0_122, %c0_123] : memref<24x80xf32, #tpu.memory_space<vmem>>, vector<16x80xf32>
    tpu.vector_store %arg16[%c0_122, %c0_123], %124 {strides = array<i32>} : memref<24x80xf32, #tpu.memory_space<vmem>>, vector<16x80xf32>,
    %cst_124 = arith.constant 0.000000e+00 : f32
    %126 = vector.broadcast %cst_124 : f32 to vector<8x80xf32>
    %c16 = arith.constant 16 : index
    %c0_125 = arith.constant 0 : index
    %127 = vector.load %arg16[%c16, %c0_125] : memref<24x80xf32, #tpu.memory_space<vmem>>, vector<8x80xf32>
    tpu.vector_store %arg16[%c16, %c0_125], %126 {strides = array<i32>} : memref<24x80xf32, #tpu.memory_space<vmem>>, vector<8x80xf32>,
    %cst_126 = arith.constant 0.000000e+00 : f32
    %128 = vector.broadcast %cst_126 : f32 to vector<16x50xf32>
    %c0_127 = arith.constant 0 : index
    %c0_128 = arith.constant 0 : index
    %129 = vector.load %arg16[%c0_127, %c0_128] : memref<24x80xf32, #tpu.memory_space<vmem>>, vector<16x80xf32>
    %c0_129 = arith.constant 0 : index
    %c0_130 = arith.constant 0 : index
    %c0_131 = arith.constant 0 : index
    %130 = vector.load %arg8[%c0_129, %c0_130, %c0_131] : memref<5x80x50xf32, #tpu.memory_space<vmem>>, vector<1x80x50xf32>
    %131 = vector.shape_cast %130 : vector<1x80x50xf32> to vector<80x50xf32>
    %cst_132 = arith.constant dense<0.000000e+00> : vector<16x50xf32>
    %132 = tpu.matmul %129, %131, %cst_132 {dimension_numbers = #tpu.dot_dimension_numbers<[1], [0], [0], [1], [0, 0, 1, 1], [], []>} : vector<16x80xf32>, vector<80x50xf32>, vector<16x50xf32> -> vector<16x50xf32>
    %133 = arith.addf %128, %132 : vector<16x50xf32>
    %c1_133 = arith.constant 1 : index
    %c0_134 = arith.constant 0 : index
    %134 = vector.load %arg16[%c1_133, %c0_134] : memref<24x80xf32, #tpu.memory_space<vmem>>, vector<16x80xf32>
    %c1_135 = arith.constant 1 : index
    %c0_136 = arith.constant 0 : index
    %c0_137 = arith.constant 0 : index
    %135 = vector.load %arg8[%c1_135, %c0_136, %c0_137] : memref<5x80x50xf32, #tpu.memory_space<vmem>>, vector<1x80x50xf32>
    %136 = vector.shape_cast %135 : vector<1x80x50xf32> to vector<80x50xf32>
    %cst_138 = arith.constant dense<0.000000e+00> : vector<16x50xf32>
    %137 = tpu.matmul %134, %136, %cst_138 {dimension_numbers = #tpu.dot_dimension_numbers<[1], [0], [0], [1], [0, 0, 1, 1], [], []>} : vector<16x80xf32>, vector<80x50xf32>, vector<16x50xf32> -> vector<16x50xf32>
    %138 = arith.addf %133, %137 : vector<16x50xf32>
    %c2_139 = arith.constant 2 : index
    %c0_140 = arith.constant 0 : index
    %139 = vector.load %arg16[%c2_139, %c0_140] : memref<24x80xf32, #tpu.memory_space<vmem>>, vector<16x80xf32>
    %c2_141 = arith.constant 2 : index
    %c0_142 = arith.constant 0 : index
    %c0_143 = arith.constant 0 : index
    %140 = vector.load %arg8[%c2_141, %c0_142, %c0_143] : memref<5x80x50xf32, #tpu.memory_space<vmem>>, vector<1x80x50xf32>
    %141 = vector.shape_cast %140 : vector<1x80x50xf32> to vector<80x50xf32>
    %cst_144 = arith.constant dense<0.000000e+00> : vector<16x50xf32>
    %142 = tpu.matmul %139, %141, %cst_144 {dimension_numbers = #tpu.dot_dimension_numbers<[1], [0], [0], [1], [0, 0, 1, 1], [], []>} : vector<16x80xf32>, vector<80x50xf32>, vector<16x50xf32> -> vector<16x50xf32>
    %143 = arith.addf %138, %142 : vector<16x50xf32>
    %c3_145 = arith.constant 3 : index
    %c0_146 = arith.constant 0 : index
    %144 = vector.load %arg16[%c3_145, %c0_146] : memref<24x80xf32, #tpu.memory_space<vmem>>, vector<16x80xf32>
    %c3_147 = arith.constant 3 : index
    %c0_148 = arith.constant 0 : index
    %c0_149 = arith.constant 0 : index
    %145 = vector.load %arg8[%c3_147, %c0_148, %c0_149] : memref<5x80x50xf32, #tpu.memory_space<vmem>>, vector<1x80x50xf32>
    %146 = vector.shape_cast %145 : vector<1x80x50xf32> to vector<80x50xf32>
    %cst_150 = arith.constant dense<0.000000e+00> : vector<16x50xf32>
    %147 = tpu.matmul %144, %146, %cst_150 {dimension_numbers = #tpu.dot_dimension_numbers<[1], [0], [0], [1], [0, 0, 1, 1], [], []>} : vector<16x80xf32>, vector<80x50xf32>, vector<16x50xf32> -> vector<16x50xf32>
    %148 = arith.addf %143, %147 : vector<16x50xf32>
    %c4_151 = arith.constant 4 : index
    %c0_152 = arith.constant 0 : index
    %149 = vector.load %arg16[%c4_151, %c0_152] : memref<24x80xf32, #tpu.memory_space<vmem>>, vector<16x80xf32>
    %c4_153 = arith.constant 4 : index
    %c0_154 = arith.constant 0 : index
    %c0_155 = arith.constant 0 : index
    %150 = vector.load %arg8[%c4_153, %c0_154, %c0_155] : memref<5x80x50xf32, #tpu.memory_space<vmem>>, vector<1x80x50xf32>
    %151 = vector.shape_cast %150 : vector<1x80x50xf32> to vector<80x50xf32>
    %cst_156 = arith.constant dense<0.000000e+00> : vector<16x50xf32>
    %152 = tpu.matmul %149, %151, %cst_156 {dimension_numbers = #tpu.dot_dimension_numbers<[1], [0], [0], [1], [0, 0, 1, 1], [], []>} : vector<16x80xf32>, vector<80x50xf32>, vector<16x50xf32> -> vector<16x50xf32>
    %153 = arith.addf %148, %152 : vector<16x50xf32>
    %c0_157 = arith.constant 0 : index
    %c0_158 = arith.constant 0 : index
    %154 = vector.load %arg9[%c0_157, %c0_158] : memref<1x50xf32, #tpu.memory_space<vmem>>, vector<1x50xf32>
    %155 = vector.broadcast %154 : vector<1x50xf32> to vector<16x50xf32>
    %156 = arith.addf %153, %155 : vector<16x50xf32>
    %cst_159 = arith.constant 0.000000e+00 : f32
    %157 = vector.broadcast %cst_159 : f32 to vector<16x50xf32>
    %158 = arith.maximumf %156, %157 : vector<16x50xf32>
    %c0_160 = arith.constant 0 : index
    %c0_161 = arith.constant 0 : index
    %159 = vector.load %arg10[%c0_160, %c0_161] : memref<50x100xf32, #tpu.memory_space<vmem>>, vector<50x100xf32>
    %cst_162 = arith.constant dense<0.000000e+00> : vector<16x100xf32>
    %160 = tpu.matmul %158, %159, %cst_162 {dimension_numbers = #tpu.dot_dimension_numbers<[1], [0], [0], [1], [0, 0, 1, 1], [], []>} : vector<16x50xf32>, vector<50x100xf32>, vector<16x100xf32> -> vector<16x100xf32>
    %c0_163 = arith.constant 0 : index
    %c0_164 = arith.constant 0 : index
    %161 = vector.load %arg11[%c0_163, %c0_164] : memref<1x100xf32, #tpu.memory_space<vmem>>, vector<1x100xf32>
    %162 = vector.broadcast %161 : vector<1x100xf32> to vector<16x100xf32>
    %163 = arith.addf %160, %162 : vector<16x100xf32>
    %164 = vector.extract_strided_slice %163 {offsets = [0, 0], sizes = [1, 100], strides = [1, 1]} : vector<16x100xf32> to vector<1x100xf32>
    %c0_165 = arith.constant 0 : index
    %c0_166 = arith.constant 0 : index
    %165 = vector.load %arg12[%c0_165, %c0_166] : memref<2x100xf32, #tpu.memory_space<vmem>>, vector<1x100xf32>
    tpu.vector_store %arg12[%c0_165, %c0_166], %164 {strides = array<i32>} : memref<2x100xf32, #tpu.memory_space<vmem>>, vector<1x100xf32>,
    %166 = vector.extract_strided_slice %163 {offsets = [8, 0], sizes = [1, 100], strides = [1, 1]} : vector<16x100xf32> to vector<1x100xf32>
    %c1_167 = arith.constant 1 : index
    %c0_168 = arith.constant 0 : index
    %167 = vector.load %arg12[%c1_167, %c0_168] : memref<2x100xf32, #tpu.memory_space<vmem>>, vector<1x100xf32>
    tpu.vector_store %arg12[%c1_167, %c0_168], %166 {strides = array<i32>} : memref<2x100xf32, #tpu.memory_space<vmem>>, vector<1x100xf32>,
    return
  }
  func.func @transform_0(%arg0: i32) -> (i32, i32) {
    %c0_i32 = arith.constant 0 : i32
    %c0_i32_0 = arith.constant 0 : i32
    %c0_i32_1 = arith.constant 0 : i32
    return %c0_i32, %c0_i32_0 : i32, i32
  }
  func.func @transform_1(%arg0: i32) -> (i32, i32, i32) {
    %c0_i32 = arith.constant 0 : i32
    %c0_i32_0 = arith.constant 0 : i32
    %c0_i32_1 = arith.constant 0 : i32
    %c0_i32_2 = arith.constant 0 : i32
    return %c0_i32, %c0_i32_0, %c0_i32_1 : i32, i32, i32
  }
  func.func @transform_2(%arg0: i32) -> (i32, i32, i32) {
    %c0_i32 = arith.constant 0 : i32
    %c0_i32_0 = arith.constant 0 : i32
    %c0_i32_1 = arith.constant 0 : i32
    %c0_i32_2 = arith.constant 0 : i32
    return %c0_i32, %c0_i32_0, %c0_i32_1 : i32, i32, i32
  }
  func.func @transform_3(%arg0: i32) -> (i32, i32) {
    %c0_i32 = arith.constant 0 : i32
    %c0_i32_0 = arith.constant 0 : i32
    %c0_i32_1 = arith.constant 0 : i32
    return %c0_i32, %c0_i32_0 : i32, i32
  }
  func.func @transform_4(%arg0: i32) -> (i32, i32, i32) {
    %c0_i32 = arith.constant 0 : i32
    %c0_i32_0 = arith.constant 0 : i32
    %c0_i32_1 = arith.constant 0 : i32
    %c0_i32_2 = arith.constant 0 : i32
    return %c0_i32, %c0_i32_0, %c0_i32_1 : i32, i32, i32
  }
  func.func @transform_5(%arg0: i32) -> (i32, i32, i32) {
    %c0_i32 = arith.constant 0 : i32
    %c0_i32_0 = arith.constant 0 : i32
    %c0_i32_1 = arith.constant 0 : i32
    %c0_i32_2 = arith.constant 0 : i32
    return %c0_i32, %c0_i32_0, %c0_i32_1 : i32, i32, i32
  }
  func.func @transform_6(%arg0: i32) -> (i32, i32) {
    %c0_i32 = arith.constant 0 : i32
    %c0_i32_0 = arith.constant 0 : i32
    %c0_i32_1 = arith.constant 0 : i32
    return %c0_i32, %c0_i32_0 : i32, i32
  }
  func.func @transform_7(%arg0: i32) -> (i32, i32, i32) {
    %c0_i32 = arith.constant 0 : i32
    %c0_i32_0 = arith.constant 0 : i32
    %c0_i32_1 = arith.constant 0 : i32
    %c0_i32_2 = arith.constant 0 : i32
    return %c0_i32, %c0_i32_0, %c0_i32_1 : i32, i32, i32
  }
  func.func @transform_8(%arg0: i32) -> (i32, i32) {
    %c0_i32 = arith.constant 0 : i32
    %c0_i32_0 = arith.constant 0 : i32
    %c0_i32_1 = arith.constant 0 : i32
    return %c0_i32, %c0_i32_0 : i32, i32
  }
  func.func @transform_9(%arg0: i32) -> (i32, i32) {
    %c0_i32 = arith.constant 0 : i32
    %c0_i32_0 = arith.constant 0 : i32
    %c0_i32_1 = arith.constant 0 : i32
    return %c0_i32, %c0_i32_0 : i32, i32
  }
  func.func @transform_10(%arg0: i32) -> (i32, i32) {
    %c0_i32 = arith.constant 0 : i32
    %c0_i32_0 = arith.constant 0 : i32
    %c0_i32_1 = arith.constant 0 : i32
    return %c0_i32, %c0_i32_0 : i32, i32
  }
  func.func @transform_11(%arg0: i32) -> (i32, i32) {
    %c0_i32 = arith.constant 0 : i32
    %c0_i32_0 = arith.constant 0 : i32
    %c0_i32_1 = arith.constant 0 : i32
    return %c0_i32, %c0_i32_0 : i32, i32
  }
}

</mosaic_0001>

<bundles_post_ra>
// kernel: basenet_forward.1
= control target key start
LH: loop header
LB: loop body
LE: loop exit
PB: predicated region body
PF: predicated region fallthrough
CT: control target
= control target key end

     0   :  { %vm92_vm0 = vcmask 785408   ;;  %s6255_s0 = inlined_call_operand.vmem [shape: f32[72,96], index: 0, kind: input, shape index: {}]   ;;  %s6256_s1 = inlined_call_operand.vmem [shape: f32[5,96,84], index: 1, kind: input, shape index: {}]   ;;  %s6257_s2 = inlined_call_operand.vmem [shape: f32[5,96,84], index: 2, kind: input, shape index: {}]   ;;  %s6258_s3 = inlined_call_operand.vmem [shape: f32[1,84], index: 3, kind: input, shape index: {}]   ;;  %s6259_s4 = inlined_call_operand.vmem [shape: f32[5,84,80], index: 4, kind: input, shape index: {}]   ;;  %s6260_s5 = inlined_call_operand.vmem [shape: f32[5,84,80], index: 5, kind: input, shape index: {}]   ;;  %s6261_s6 = inlined_call_operand.vmem [shape: f32[1,80], index: 6, kind: input, shape index: {}]   ;;  %s6262_s7 = inlined_call_operand.vmem [shape: f32[5,80,50], index: 7, kind: input, shape index: {}]   ;;  %s6263_s8 = inlined_call_operand.vmem [shape: f32[1,50], index: 8, kind: input, shape index: {}]   ;;  %s6264_s9 = inlined_call_operand.vmem [shape: f32[50,100], index: 9, kind: input, shape index: {}]   ;;  %s6265_s10 = inlined_call_operand.vmem [shape: f32[1,100], index: 10, kind: input, shape index: {}]   ;;  %s6266_s11 = inlined_call_operand.hbm [shape: f32[2,100], index: 11, kind: output, shape index: {}]  }
   0x1   :  { %v3267_v0 = vld [vmem:[%s6256_s1 + $0xb8] sm:$0xff]  ;;  %v3266_v2 = vld [vmem:[%s6256_s1 + $0xb0] sm:$0xff]  ;;  %v3265_v4 = vld [vmem:[%s6256_s1 + $0xa8] sm:$0xff] }
   0x2   :  { %v58_v1 = vld [vmem:[%s6256_s1 + $0x58] sm:$0xff]  ;;  %4046 = vmatprep.subr.mxu0 %v3267_v0  ;;  %v57_v3 = vld [vmem:[%s6256_s1 + $0x50] sm:$0xff]  ;;  %v56_v5 = vld [vmem:[%s6256_s1 + $0x48] sm:$0xff] }
   0x3   :  { %4082 = vmatprep.subr.mxu1 %v58_v1  ;;  %4047 = vmatpush3.msra.mxu0 %v3267_v0  ;;  %v3264_v6 = vld [vmem:[%s6256_s1 + $0xa0] sm:$0xff]  ;;  %v3263_v8 = vld [vmem:[%s6256_s1 + $0x98] sm:$0xff]  ;;  %v3262_v10 = vld [vmem:[%s6256_s1 + $0x90] sm:$0xff] }
   0x4   :  { %4083 = vmatpush3.msra.mxu1 %v58_v1  ;;  %4048 = vmatprep.subr.mxu0 %v3266_v2  ;;  %v55_v7 = vld [vmem:[%s6256_s1 + $0x40] sm:$0xff]  ;;  %v54_v9 = vld [vmem:[%s6256_s1 + $0x38] sm:$0xff]  ;;  %v53_v11 = vld [vmem:[%s6256_s1 + $0x30] sm:$0xff] }
   0x5   :  { %4084 = vmatprep.subr.mxu1 %v57_v3  ;;  %4049 = vmatpush3.msra.mxu0 %v3266_v2  ;;  %v3261_v12 = vld [vmem:[%s6256_s1 + $0x88] sm:$0xff]  ;;  %v3260_v14 = vld [vmem:[%s6256_s1 + $0x80] sm:$0xff]  ;;  %v3259_v16 = vld [vmem:[%s6256_s1 + $0x78] sm:$0xff] }
   0x6   :  { %4085 = vmatpush3.msra.mxu1 %v57_v3  ;;  %4050 = vmatprep.subr.mxu0 %v3265_v4  ;;  %v52_v13 = vld [vmem:[%s6256_s1 + $0x28] sm:$0xff]  ;;  %v51_v15 = vld [vmem:[%s6256_s1 + $0x20] sm:$0xff]  ;;  %v50_v17 = vld [vmem:[%s6256_s1 + $0x18] sm:$0xff] }
   0x7   :  { %4086 = vmatprep.subr.mxu1 %v56_v5  ;;  %4051 = vmatpush3.msra.mxu0 %v3265_v4  ;;  %v3258_v18 = vld [vmem:[%s6256_s1 + $0x70] sm:$0xff]  ;;  %v3257_v20 = vld [vmem:[%s6256_s1 + $0x68] sm:$0xff]  ;;  %v3256_v22 = vld [vmem:[%s6256_s1 + $0x60] sm:$0xff] }
   0x8   :  { %4087 = vmatpush3.msra.mxu1 %v56_v5  ;;  %4052 = vmatprep.subr.mxu0 %v3264_v6  ;;  %v49_v19 = vld [vmem:[%s6256_s1 + $0x10] sm:$0xff]  ;;  %v48_v21 = vld [vmem:[%s6256_s1 + $0x8] sm:$0xff]  ;;  %v47_v23 = vld [vmem:[%s6256_s1] sm:$0xff] }
   0x9   :  { %4088 = vmatprep.subr.mxu1 %v55_v7  ;;  %4053 = vmatpush3.msra.mxu0 %v3264_v6  ;;  %v4979_v24 = vld [vmem:[%s6255_s0 + $0x1] sm:$0xff]  ;;  %v4989_v26 = vld [vmem:[%s6255_s0 + $0x9] sm:$0xff]  ;;  %v3295_v28 = vld [vmem:[%s6257_s2 + $0xb8] sm:$0xff] }
   0xa   :  { %4089 = vmatpush3.msra.mxu1 %v55_v7  ;;  %4054 = vmatprep.subr.mxu0 %v3263_v8  ;;  %v4984_v25 = vld [vmem:[%s6255_s0] sm:$0xff]  ;;  %v4994_v27 = vld [vmem:[%s6255_s0 + $0x8] sm:$0xff]  ;;  %v70_v29 = vld [vmem:[%s6257_s2 + $0x58] sm:$0xff] }
   0xb   :  { %4090 = vmatprep.subr.mxu1 %v54_v9  ;;  %4055 = vmatpush3.msra.mxu0 %v3263_v8  ;;  %v3294_v30 = vld [vmem:[%s6257_s2 + $0xb0] sm:$0xff]  ;;  %v3293_v32 = vld [vmem:[%s6257_s2 + $0xa8] sm:$0xff]  ;;  %v3292_v34 = vld [vmem:[%s6257_s2 + $0xa0] sm:$0xff] }
   0xc   :  { %4091 = vmatpush3.msra.mxu1 %v54_v9  ;;  %4056 = vmatprep.subr.mxu0 %v3262_v10  ;;  %v69_v31 = vld [vmem:[%s6257_s2 + $0x50] sm:$0xff]  ;;  %v68_v33 = vld [vmem:[%s6257_s2 + $0x48] sm:$0xff]  ;;  %v67_v35 = vld [vmem:[%s6257_s2 + $0x40] sm:$0xff] }
   0xd   :  { %4092 = vmatprep.subr.mxu1 %v53_v11  ;;  %4057 = vmatpush3.msra.mxu0 %v3262_v10  ;;  %v3291_v36 = vld [vmem:[%s6257_s2 + $0x98] sm:$0xff]  ;;  %v5042_v39 = vld [vmem:[%s6255_s0 + $0x10] sm:$0xff]  ;;  %v3289_v44 = vld [vmem:[%s6257_s2 + $0x88] sm:$0xff] }
   0xe   :  { %4093 = vmatpush3.msra.mxu1 %v53_v11  ;;  %4058 = vmatprep.subr.mxu0 %v3261_v12  ;;  %v66_v37 = vld [vmem:[%s6257_s2 + $0x38] sm:$0xff]  ;;  %v3290_v40 = vld [vmem:[%s6257_s2 + $0x90] sm:$0xff]  ;;  %v64_v45 = vld [vmem:[%s6257_s2 + $0x28] sm:$0xff] }
   0xf   :  { %4094 = vmatprep.subr.mxu1 %v52_v13  ;;  %4059 = vmatpush3.msra.mxu0 %v3261_v12  ;;  %v5037_v38 = vld [vmem:[%s6255_s0 + $0x11] sm:$0xff]  ;;  %v5053_v42 = vld [vmem:[%s6255_s0 + $0x19] sm:$0xff]  ;;  %v5077_v46 = vld [vmem:[%s6255_s0 + $0x21] sm:$0xff] }
  0x10   :  { %4095 = vmatpush3.msra.mxu1 %v52_v13  ;;  %4060 = vmatprep.subr.mxu0 %v3260_v14  ;;  %v65_v41 = vld [vmem:[%s6257_s2 + $0x30] sm:$0xff]  ;;  %v5058_v43 = vld [vmem:[%s6255_s0 + $0x18] sm:$0xff]  ;;  %v5082_v47 = vld [vmem:[%s6255_s0 + $0x20] sm:$0xff] }
  0x11   :  { %4096 = vmatprep.subr.mxu1 %v51_v15  ;;  %4061 = vmatpush3.msra.mxu0 %v3260_v14  ;;  %v3288_v48 = vld [vmem:[%s6257_s2 + $0x80] sm:$0xff]  ;;  %v5093_v50 = vld [vmem:[%s6255_s0 + $0x29] sm:$0xff]  ;;  %v3287_v52 = vld [vmem:[%s6257_s2 + $0x78] sm:$0xff] }
  0x12   :  { %4097 = vmatpush3.msra.mxu1 %v51_v15  ;;  %4062 = vmatprep.subr.mxu0 %v3259_v16  ;;  %v63_v49 = vld [vmem:[%s6257_s2 + $0x20] sm:$0xff]  ;;  %v5098_v51 = vld [vmem:[%s6255_s0 + $0x28] sm:$0xff]  ;;  %v62_v53 = vld [vmem:[%s6257_s2 + $0x18] sm:$0xff] }
  0x13   :  { %4098 = vmatprep.subr.mxu1 %v50_v17  ;;  %4063 = vmatpush3.msra.mxu0 %v3259_v16  ;;  %v5117_v54 = vld [vmem:[%s6255_s0 + $0x31] sm:$0xff]  ;;  %v5133_v58 = vld [vmem:[%s6255_s0 + $0x39] sm:$0xff]  ;;  %v3285_v60 = vld [vmem:[%s6257_s2 + $0x68] sm:$0xff] }
  0x14   :  { %4099 = vmatpush3.msra.mxu1 %v50_v17  ;;  %4064 = vmatprep.subr.mxu0 %v3258_v18  ;;  %v5122_v55 = vld [vmem:[%s6255_s0 + $0x30] sm:$0xff]  ;;  %v5138_v59 = vld [vmem:[%s6255_s0 + $0x38] sm:$0xff]  ;;  %v60_v61 = vld [vmem:[%s6257_s2 + $0x8] sm:$0xff] }
  0x15   :  { %4100 = vmatprep.subr.mxu1 %v49_v19  ;;  %4065 = vmatpush3.msra.mxu0 %v3258_v18  ;;  %v3286_v56 = vld [vmem:[%s6257_s2 + $0x70] sm:$0xff]  ;;  %v3284_v62 = vld [vmem:[%s6257_s2 + $0x60] sm:$0xff] }
  0x16   :  { %4101 = vmatpush3.msra.mxu1 %v49_v19  ;;  %4066 = vmatprep.subr.mxu0 %v3257_v20  ;;  %v61_v57 = vld [vmem:[%s6257_s2 + $0x10] sm:$0xff]  ;;  %v59_v63 = vld [vmem:[%s6257_s2] sm:$0xff] }
  0x17   :  { %4102 = vmatprep.subr.mxu1 %v48_v21  ;;  %4067 = vmatpush3.msra.mxu0 %v3257_v20 }
  0x18   :  { %4103 = vmatpush3.msra.mxu1 %v48_v21  ;;  %4068 = vmatprep.subr.mxu0 %v3256_v22 }
  0x19   :  { %4104 = vmatprep.subr.mxu1 %v47_v23  ;;  %4069 = vmatpush3.msra.mxu0 %v3256_v22 }
  0x1a   :  { %4070 = vmatprep.mubr.msk.f32.mxu0 %vm92_vm0, %v4979_v24  ;;  %4105 = vmatpush3.msra.mxu1 %v47_v23 }
  0x1b   :  { %4106 = vmatprep.mubr.msk.f32.mxu1 %vm92_vm0, %v4984_v25  ;;  %4071 = vmatmul.mubr.msk.f32.vlgmr.msra.gmra.mxu0 %vm92_vm0, %v4989_v26 }
  0x1c   :  { %4107 = vmatmul.mubr.msk.f32.vlgmr.msra.gmra.mxu1 %vm92_vm0, %v4994_v27  ;;  %4118 = vmatprep.subr.mxu0 %v3295_v28 }
  0x1d   :  { %4154 = vmatprep.subr.mxu1 %v70_v29  ;;  %4119 = vmatpush3.msra.mxu0 %v3295_v28 }
  0x1e   :  { %4155 = vmatpush3.msra.mxu1 %v70_v29  ;;  %4120 = vmatprep.subr.mxu0 %v3294_v30 }
  0x1f   :  { %4156 = vmatprep.subr.mxu1 %v69_v31  ;;  %4121 = vmatpush3.msra.mxu0 %v3294_v30 }
  0x20   :  { %4157 = vmatpush3.msra.mxu1 %v69_v31  ;;  %4122 = vmatprep.subr.mxu0 %v3293_v32 }
  0x21   :  { %4158 = vmatprep.subr.mxu1 %v68_v33  ;;  %4123 = vmatpush3.msra.mxu0 %v3293_v32 }
  0x22   :  { %4159 = vmatpush3.msra.mxu1 %v68_v33  ;;  %4124 = vmatprep.subr.mxu0 %v3292_v34 }
  0x23   :  { %4160 = vmatprep.subr.mxu1 %v67_v35  ;;  %4125 = vmatpush3.msra.mxu0 %v3292_v34 }
  0x24   :  { %4161 = vmatpush3.msra.mxu1 %v67_v35  ;;  %4126 = vmatprep.subr.mxu0 %v3291_v36 }
  0x25   :  { %4162 = vmatprep.subr.mxu1 %v66_v37  ;;  %4127 = vmatpush3.msra.mxu0 %v3291_v36 }
  0x26   :  { %4163 = vmatpush3.msra.mxu1 %v66_v37  ;;  %4073 = vmatprep.mubr.msk.f32.mxu0 %vm92_vm0, %v5037_v38 }
  0x27   :  { %4109 = vmatprep.mubr.msk.f32.mxu1 %vm92_vm0, %v5042_v39  ;;  %4128 = vmatprep.subr.mxu0 %v3290_v40 }
  0x28   :  { %4164 = vmatprep.subr.mxu1 %v65_v41  ;;  %4074 = vmatmul.mubr.msk.f32.gmra.mxu0 %vm92_vm0, %v5053_v42 }
  0x29   :  { %4110 = vmatmul.mubr.msk.f32.gmra.mxu1 %vm92_vm0, %v5058_v43  ;;  %4129 = vmatpush3.msra.mxu0 %v3290_v40 }
  0x2a   :  { %4165 = vmatpush3.msra.mxu1 %v65_v41  ;;  %4130 = vmatprep.subr.mxu0 %v3289_v44 }
  0x2b   :  { %4166 = vmatprep.subr.mxu1 %v64_v45  ;;  %4131 = vmatpush3.msra.mxu0 %v3289_v44 }
  0x2c   :  { %4167 = vmatpush3.msra.mxu1 %v64_v45  ;;  %4076 = vmatprep.mubr.msk.f32.mxu0 %vm92_vm0, %v5077_v46 }
  0x2d   :  { %4112 = vmatprep.mubr.msk.f32.mxu1 %vm92_vm0, %v5082_v47  ;;  %4132 = vmatprep.subr.mxu0 %v3288_v48 }
  0x2e   :  { %4168 = vmatprep.subr.mxu1 %v63_v49  ;;  %4077 = vmatmul.mubr.msk.f32.gmra.mxu0 %vm92_vm0, %v5093_v50 }
  0x2f   :  { %4113 = vmatmul.mubr.msk.f32.gmra.mxu1 %vm92_vm0, %v5098_v51  ;;  %4133 = vmatpush3.msra.mxu0 %v3288_v48 }
  0x30   :  { %4169 = vmatpush3.msra.mxu1 %v63_v49  ;;  %4134 = vmatprep.subr.mxu0 %v3287_v52 }
  0x31   :  { %4170 = vmatprep.subr.mxu1 %v62_v53  ;;  %4135 = vmatpush3.msra.mxu0 %v3287_v52 }
  0x32   :  { %4171 = vmatpush3.msra.mxu1 %v62_v53  ;;  %4079 = vmatprep.mubr.msk.f32.mxu0 %vm92_vm0, %v5117_v54 }
  0x33   :  { %4115 = vmatprep.mubr.msk.f32.mxu1 %vm92_vm0, %v5122_v55  ;;  %4136 = vmatprep.subr.mxu0 %v3286_v56 }
  0x34   :  { %4172 = vmatprep.subr.mxu1 %v61_v57  ;;  %4080 = vmatmul.mubr.msk.f32.gmra.mxu0 %vm92_vm0, %v5133_v58 }
  0x35   :  { %4116 = vmatmul.mubr.msk.f32.gmra.mxu1 %vm92_vm0, %v5138_v59  ;;  %4137 = vmatpush3.msra.mxu0 %v3286_v56 }
  0x36   :  { %4173 = vmatpush3.msra.mxu1 %v61_v57  ;;  %4138 = vmatprep.subr.mxu0 %v3285_v60 }
  0x37   :  { %4174 = vmatprep.subr.mxu1 %v60_v61 }
  0x38   :  { %16 = vsyncpa [#allocation7], 0  ;;  %4139 = vmatpush3.msra.mxu0 %v3285_v60  ;;  %4175 = vmatpush3.msra.mxu1 %v60_v61  ;;  %v3323_v0 = vld [vmem:[%s6256_s1 + $0x118] sm:$0xff]  ;;  %v3322_v2 = vld [vmem:[%s6256_s1 + $0x110] sm:$0xff]  ;;  %vm1560_vm1 = vcmask 1043456   ;;  %vm1473_vm2 = vcmask 687104  }
  0x39   :  { %4140 = vmatprep.subr.mxu0 %v3284_v62  ;;  %4176 = vmatprep.subr.mxu1 %v59_v63  ;;  %v3343_v1 = vld [vmem:[%s6257_s2 + $0x118] sm:$0xff]  ;;  %v3342_v3 = vld [vmem:[%s6257_s2 + $0x110] sm:$0xff]  ;;  %v3321_v4 = vld [vmem:[%s6256_s1 + $0x108] sm:$0xff]  ;;  %vm2636_vm3 = vcmask 654336   ;;  %vm3160_vm4 = vcmask 1041408   ;;  %vm3153_vm5 = vcmask 408576  }
  0x3a   :  { %4141 = vmatpush3.msra.mxu0 %v3284_v62  ;;  %4142 = vmatprep.mubr.msk.f32.mxu0 %vm92_vm0, %v4979_v24  ;;  %v3341_v5 = vld [vmem:[%s6257_s2 + $0x108] sm:$0xff]  ;;  %v3320_v6 = vld [vmem:[%s6256_s1 + $0x100] sm:$0xff]  ;;  %v3319_v8 = vld [vmem:[%s6256_s1 + $0xf8] sm:$0xff]  ;;  %vm3239_vm6 = vcmask 811008   ;;  %s4843_s17 = smov [#allocation6]  }
  0x3b   :  { %4177 = vmatpush3.msra.mxu1 %v59_v63  ;;  %4178 = vmatprep.mubr.msk.f32.mxu1 %vm92_vm0, %v4984_v25  ;;  %v3340_v7 = vld [vmem:[%s6257_s2 + $0x100] sm:$0xff]  ;;  %v3339_v9 = vld [vmem:[%s6257_s2 + $0xf8] sm:$0xff]  ;;  %v3318_v10 = vld [vmem:[%s6256_s1 + $0xf0] sm:$0xff]  ;;  %s3248_s18 = sshll.u32 %s4843_s17, 4  ;;  %s3249_s18 = int_to_ptr.vmem [resolvable:$true] %s3248_s18 }
  0x3c   :  { %4143 = vmatmul.mubr.msk.f32.vlgmr.msra.gmra.mxu0 %vm92_vm0, %v4989_v26  ;;  %4179 = vmatmul.mubr.msk.f32.vlgmr.msra.gmra.mxu1 %vm92_vm0, %v4994_v27  ;;  %v3338_v11 = vld [vmem:[%s6257_s2 + $0xf0] sm:$0xff]  ;;  %v3317_v12 = vld [vmem:[%s6256_s1 + $0xe8] sm:$0xff]  ;;  %v3316_v14 = vld [vmem:[%s6256_s1 + $0xe0] sm:$0xff]  ;;  %p4825_p1 = scmp.lt.s32.totalorder %s3249_s18, %s3249_s18 }
  0x3d   :  { %4190 = vmatprep.subr.mxu0 %v3323_v0  ;;  %4226 = vmatprep.subr.mxu1 %v3343_v1  ;;  %v3337_v13 = vld [vmem:[%s6257_s2 + $0xe8] sm:$0xff]  ;;  %v3336_v15 = vld [vmem:[%s6257_s2 + $0xe0] sm:$0xff]  ;;  %v3315_v16 = vld [vmem:[%s6256_s1 + $0xd8] sm:$0xff] }
  0x3e   :  { %4191 = vmatpush3.msra.mxu0 %v3323_v0  ;;  %4227 = vmatpush3.msra.mxu1 %v3343_v1  ;;  %v3335_v17 = vld [vmem:[%s6257_s2 + $0xd8] sm:$0xff]  ;;  %v3314_v18 = vld [vmem:[%s6256_s1 + $0xd0] sm:$0xff]  ;;  %v3313_v20 = vld [vmem:[%s6256_s1 + $0xc8] sm:$0xff] }
  0x3f   :  { %4192 = vmatprep.subr.mxu0 %v3322_v2  ;;  %4228 = vmatprep.subr.mxu1 %v3342_v3  ;;  %v3334_v19 = vld [vmem:[%s6257_s2 + $0xd0] sm:$0xff]  ;;  %v3333_v21 = vld [vmem:[%s6257_s2 + $0xc8] sm:$0xff]  ;;  %v3312_v22 = vld [vmem:[%s6256_s1 + $0xc0] sm:$0xff] }
  0x40   :  { %4193 = vmatpush3.msra.mxu0 %v3322_v2  ;;  %4229 = vmatpush3.msra.mxu1 %v3342_v3  ;;  %v3332_v23 = vld [vmem:[%s6257_s2 + $0xc0] sm:$0xff]  ;;  %v575_v25 = vld [vmem:[%s6255_s0 + $0xa] sm:$0xff]  ;;  %v3363_v26 = vld [vmem:[%s6256_s1 + $0x178] sm:$0xff] }
  0x41   :  { %4194 = vmatprep.subr.mxu0 %v3321_v4  ;;  %4230 = vmatprep.subr.mxu1 %v3341_v5  ;;  %v574_v24 = vld [vmem:[%s6255_s0 + $0x2] sm:$0xff]  ;;  %v3383_v27 = vld [vmem:[%s6257_s2 + $0x178] sm:$0xff]  ;;  %v3362_v28 = vld [vmem:[%s6256_s1 + $0x170] sm:$0xff] }
  0x42   :  { %4195 = vmatpush3.msra.mxu0 %v3321_v4  ;;  %4231 = vmatpush3.msra.mxu1 %v3341_v5  ;;  %v3382_v29 = vld [vmem:[%s6257_s2 + $0x170] sm:$0xff]  ;;  %v577_v31 = vld [vmem:[%s6255_s0 + $0x1a] sm:$0xff]  ;;  %v3361_v32 = vld [vmem:[%s6256_s1 + $0x168] sm:$0xff] }
  0x43   :  { %4196 = vmatprep.subr.mxu0 %v3320_v6  ;;  %4232 = vmatprep.subr.mxu1 %v3340_v7  ;;  %v576_v30 = vld [vmem:[%s6255_s0 + $0x12] sm:$0xff]  ;;  %v3381_v33 = vld [vmem:[%s6257_s2 + $0x168] sm:$0xff]  ;;  %v3360_v34 = vld [vmem:[%s6256_s1 + $0x160] sm:$0xff] }
  0x44   :  { %4197 = vmatpush3.msra.mxu0 %v3320_v6  ;;  %4233 = vmatpush3.msra.mxu1 %v3340_v7  ;;  %v3380_v35 = vld [vmem:[%s6257_s2 + $0x160] sm:$0xff]  ;;  %v579_v37 = vld [vmem:[%s6255_s0 + $0x2a] sm:$0xff]  ;;  %v3355_v48 = vld [vmem:[%s6256_s1 + $0x138] sm:$0xff] }
  0x45   :  { %4198 = vmatprep.subr.mxu0 %v3319_v8  ;;  %4234 = vmatprep.subr.mxu1 %v3339_v9  ;;  %v578_v36 = vld [vmem:[%s6255_s0 + $0x22] sm:$0xff]  ;;  %v3358_v40 = vld [vmem:[%s6256_s1 + $0x150] sm:$0xff]  ;;  %v3375_v49 = vld [vmem:[%s6257_s2 + $0x138] sm:$0xff] }
  0x46   :  { %4199 = vmatpush3.msra.mxu0 %v3319_v8  ;;  %4235 = vmatpush3.msra.mxu1 %v3339_v9  ;;  %v3378_v41 = vld [vmem:[%s6257_s2 + $0x150] sm:$0xff]  ;;  %v3357_v44 = vld [vmem:[%s6256_s1 + $0x148] sm:$0xff]  ;;  %v861_v63 = vld [vmem:[%s6255_s0 + $0x1b] sm:$0xff] }
  0x47   :  { %4145 = vmatprep.mubr.msk.f32.mxu0 %vm92_vm0, %v5037_v38  ;;  %4181 = vmatprep.mubr.msk.f32.mxu1 %vm92_vm0, %v5042_v39  ;;  %v3359_v38 = vld [vmem:[%s6256_s1 + $0x158] sm:$0xff]  ;;  %v3377_v45 = vld [vmem:[%s6257_s2 + $0x148] sm:$0xff]  ;;  %v3402_v60 = vld [vmem:[%s6256_s1 + $0x1d0] sm:$0xff] }
  0x48   :  { %4200 = vmatprep.subr.mxu0 %v3318_v10  ;;  %4236 = vmatprep.subr.mxu1 %v3338_v11  ;;  %v3379_v39 = vld [vmem:[%s6257_s2 + $0x158] sm:$0xff]  ;;  %v3353_v52 = vld [vmem:[%s6256_s1 + $0x128] sm:$0xff]  ;;  %v3422_v61 = vld [vmem:[%s6257_s2 + $0x1d0] sm:$0xff] }
  0x49   :  { %4146 = vmatmul.mubr.msk.f32.gmra.mxu0 %vm92_vm0, %v5053_v42  ;;  %4182 = vmatmul.mubr.msk.f32.gmra.mxu1 %vm92_vm0, %v5058_v43  ;;  %v580_v42 = vld [vmem:[%s6255_s0 + $0x32] sm:$0xff]  ;;  %v581_v43 = vld [vmem:[%s6255_s0 + $0x3a] sm:$0xff]  ;;  %v3373_v53 = vld [vmem:[%s6257_s2 + $0x128] sm:$0xff] }
  0x4a   :  { %4201 = vmatpush3.msra.mxu0 %v3318_v10  ;;  %4237 = vmatpush3.msra.mxu1 %v3338_v11  ;;  %v858_v56 = vld [vmem:[%s6255_s0 + $0x3] sm:$0xff]  ;;  %v859_v57 = vld [vmem:[%s6255_s0 + $0xb] sm:$0xff]  ;;  %v860_v62 = vld [vmem:[%s6255_s0 + $0x13] sm:$0xff] }
  0x4b   :  { %4202 = vmatprep.subr.mxu0 %v3317_v12  ;;  %4238 = vmatprep.subr.mxu1 %v3337_v13  ;;  %v3401_v0 = vld [vmem:[%s6256_s1 + $0x1c8] sm:$0xff]  ;;  %v3400_v2 = vld [vmem:[%s6256_s1 + $0x1c0] sm:$0xff]  ;;  %v3399_v6 = vld [vmem:[%s6256_s1 + $0x1b8] sm:$0xff] }
  0x4c   :  { %4203 = vmatpush3.msra.mxu0 %v3317_v12  ;;  %4239 = vmatpush3.msra.mxu1 %v3337_v13  ;;  %v3421_v1 = vld [vmem:[%s6257_s2 + $0x1c8] sm:$0xff]  ;;  %v3420_v3 = vld [vmem:[%s6257_s2 + $0x1c0] sm:$0xff]  ;;  %v3419_v7 = vld [vmem:[%s6257_s2 + $0x1b8] sm:$0xff] }
  0x4d   :  { %4148 = vmatprep.mubr.msk.f32.mxu0 %vm92_vm0, %v5077_v46  ;;  %4184 = vmatprep.mubr.msk.f32.mxu1 %vm92_vm0, %v5082_v47  ;;  %v3356_v46 = vld [vmem:[%s6256_s1 + $0x140] sm:$0xff]  ;;  %v863_v5 = vld [vmem:[%s6255_s0 + $0x2b] sm:$0xff]  ;;  %v864_v10 = vld [vmem:[%s6255_s0 + $0x33] sm:$0xff] }
  0x4e   :  { %4204 = vmatprep.subr.mxu0 %v3316_v14  ;;  %4240 = vmatprep.subr.mxu1 %v3336_v15  ;;  %v3376_v47 = vld [vmem:[%s6257_s2 + $0x140] sm:$0xff]  ;;  %v3398_v8 = vld [vmem:[%s6256_s1 + $0x1b0] sm:$0xff]  ;;  %v3397_v12 = vld [vmem:[%s6256_s1 + $0x1a8] sm:$0xff] }
  0x4f   :  { %4149 = vmatmul.mubr.msk.f32.gmra.mxu0 %vm92_vm0, %v5093_v50  ;;  %4185 = vmatmul.mubr.msk.f32.gmra.mxu1 %vm92_vm0, %v5098_v51  ;;  %v3354_v50 = vld [vmem:[%s6256_s1 + $0x130] sm:$0xff]  ;;  %v862_v4 = vld [vmem:[%s6255_s0 + $0x23] sm:$0xff]  ;;  %v865_v11 = vld [vmem:[%s6255_s0 + $0x3b] sm:$0xff] }
  0x50   :  { %4205 = vmatpush3.msra.mxu0 %v3316_v14  ;;  %4241 = vmatpush3.msra.mxu1 %v3336_v15  ;;  %v3374_v51 = vld [vmem:[%s6257_s2 + $0x130] sm:$0xff]  ;;  %v3417_v13 = vld [vmem:[%s6257_s2 + $0x1a8] sm:$0xff]  ;;  %v3396_v14 = vld [vmem:[%s6256_s1 + $0x1a0] sm:$0xff] }
  0x51   :  { %4206 = vmatprep.subr.mxu0 %v3315_v16  ;;  %4242 = vmatprep.subr.mxu1 %v3335_v17  ;;  %v3418_v9 = vld [vmem:[%s6257_s2 + $0x1b0] sm:$0xff]  ;;  %v3416_v15 = vld [vmem:[%s6257_s2 + $0x1a0] sm:$0xff] }
  0x52   :  { %4207 = vmatpush3.msra.mxu0 %v3315_v16  ;;  %4243 = vmatpush3.msra.mxu1 %v3335_v17  ;;  %v3395_v16 = vld [vmem:[%s6256_s1 + $0x198] sm:$0xff] }
  0x53   :  { %4151 = vmatprep.mubr.msk.f32.mxu0 %vm92_vm0, %v5117_v54  ;;  %4187 = vmatprep.mubr.msk.f32.mxu1 %vm92_vm0, %v5122_v55  ;;  %v3352_v54 = vld [vmem:[%s6256_s1 + $0x120] sm:$0xff]  ;;  %v3415_v17 = vld [vmem:[%s6257_s2 + $0x198] sm:$0xff] }
  0x54   :  { %4208 = vmatprep.subr.mxu0 %v3314_v18  ;;  %4244 = vmatprep.subr.mxu1 %v3334_v19  ;;  %v3372_v55 = vld [vmem:[%s6257_s2 + $0x120] sm:$0xff] }
  0x55   :  { %4152 = vmatmul.mubr.msk.f32.gmra.mxu0 %vm92_vm0, %v5133_v58  ;;  %4188 = vmatmul.mubr.msk.f32.gmra.mxu1 %vm92_vm0, %v5138_v59  ;;  %v3403_v58 = vld [vmem:[%s6256_s1 + $0x1d8] sm:$0xff] }
  0x56   :  { %4209 = vmatpush3.msra.mxu0 %v3314_v18  ;;  %4245 = vmatpush3.msra.mxu1 %v3334_v19  ;;  %v3423_v59 = vld [vmem:[%s6257_s2 + $0x1d8] sm:$0xff]  ;;  %v3394_v18 = vld [vmem:[%s6256_s1 + $0x190] sm:$0xff] }
  0x57   :  { %4210 = vmatprep.subr.mxu0 %v3313_v20  ;;  %4246 = vmatprep.subr.mxu1 %v3333_v21  ;;  %v3414_v19 = vld [vmem:[%s6257_s2 + $0x190] sm:$0xff] }
  0x58   :  { %4211 = vmatpush3.msra.mxu0 %v3313_v20  ;;  %4247 = vmatpush3.msra.mxu1 %v3333_v21  ;;  %v3393_v20 = vld [vmem:[%s6256_s1 + $0x188] sm:$0xff] }
  0x59   :  { %4212 = vmatprep.subr.mxu0 %v3312_v22  ;;  %4248 = vmatprep.subr.mxu1 %v3332_v23  ;;  %v3413_v21 = vld [vmem:[%s6257_s2 + $0x188] sm:$0xff] }
  0x5a   :  { %4213 = vmatpush3.msra.mxu0 %v3312_v22  ;;  %4214 = vmatprep.mubr.msk.f32.mxu0 %vm92_vm0, %v574_v24  ;;  %v3392_v22 = vld [vmem:[%s6256_s1 + $0x180] sm:$0xff] }
  0x5b   :  { %4249 = vmatpush3.msra.mxu1 %v3332_v23  ;;  %4250 = vmatprep.mubr.msk.f32.mxu1 %vm92_vm0, %v574_v24  ;;  %v3412_v23 = vld [vmem:[%s6257_s2 + $0x180] sm:$0xff] }
  0x5c   :  { %4215 = vmatmul.mubr.msk.f32.vlgmr.msra.gmra.mxu0 %vm92_vm0, %v575_v25  ;;  %4251 = vmatmul.mubr.msk.f32.vlgmr.msra.gmra.mxu1 %vm92_vm0, %v575_v25  ;;  %v1142_v24 = vld [vmem:[%s6255_s0 + $0x4] sm:$0xff]  ;;  %v1143_v25 = vld [vmem:[%s6255_s0 + $0xc] sm:$0xff] }
  0x5d   :  { %4262 = vmatprep.subr.mxu0 %v3363_v26  ;;  %4298 = vmatprep.subr.mxu1 %v3383_v27 }
  0x5e   :  { %4263 = vmatpush3.msra.mxu0 %v3363_v26  ;;  %4299 = vmatpush3.msra.mxu1 %v3383_v27  ;;  %v1144_v26 = vld [vmem:[%s6255_s0 + $0x14] sm:$0xff]  ;;  %v1145_v27 = vld [vmem:[%s6255_s0 + $0x1c] sm:$0xff] }
  0x5f   :  { %4264 = vmatprep.subr.mxu0 %v3362_v28  ;;  %4300 = vmatprep.subr.mxu1 %v3382_v29 }
  0x60   :  { %4217 = vmatprep.mubr.msk.f32.mxu0 %vm92_vm0, %v576_v30  ;;  %4253 = vmatprep.mubr.msk.f32.mxu1 %vm92_vm0, %v576_v30  ;;  %v1148_v30 = vld [vmem:[%s6255_s0 + $0x34] sm:$0xff] }
  0x61   :  { %4265 = vmatpush3.msra.mxu0 %v3362_v28  ;;  %4301 = vmatpush3.msra.mxu1 %v3382_v29  ;;  %v1146_v28 = vld [vmem:[%s6255_s0 + $0x24] sm:$0xff]  ;;  %v1147_v29 = vld [vmem:[%s6255_s0 + $0x2c] sm:$0xff] }
  0x62   :  { %4218 = vmatmul.mubr.msk.f32.gmra.mxu0 %vm92_vm0, %v577_v31  ;;  %4254 = vmatmul.mubr.msk.f32.gmra.mxu1 %vm92_vm0, %v577_v31  ;;  %v1149_v31 = vld [vmem:[%s6255_s0 + $0x3c] sm:$0xff] }
  0x63   :  { %4266 = vmatprep.subr.mxu0 %v3361_v32  ;;  %4302 = vmatprep.subr.mxu1 %v3381_v33 }
  0x64   :  { %4267 = vmatpush3.msra.mxu0 %v3361_v32  ;;  %4303 = vmatpush3.msra.mxu1 %v3381_v33 }
  0x65   :  { %4268 = vmatprep.subr.mxu0 %v3360_v34  ;;  %4304 = vmatprep.subr.mxu1 %v3380_v35 }
  0x66   :  { %4220 = vmatprep.mubr.msk.f32.mxu0 %vm92_vm0, %v578_v36  ;;  %4256 = vmatprep.mubr.msk.f32.mxu1 %vm92_vm0, %v578_v36 }
  0x67   :  { %4269 = vmatpush3.msra.mxu0 %v3360_v34  ;;  %4305 = vmatpush3.msra.mxu1 %v3380_v35  ;;  %v1520_v34 = vld [vmem:[%s6259_s4 + $0x50] sm:$0xf]  ;;  %v1519_v35 = vld [vmem:[%s6259_s4 + $0x48] sm:$0xff] }
  0x68   :  { %4221 = vmatmul.mubr.msk.f32.gmra.mxu0 %vm92_vm0, %v579_v37  ;;  %4257 = vmatmul.mubr.msk.f32.gmra.mxu1 %vm92_vm0, %v579_v37 }
  0x69   :  { %4270 = vmatprep.subr.mxu0 %v3359_v38  ;;  %4306 = vmatprep.subr.mxu1 %v3379_v39 }
  0x6a   :  { %4271 = vmatpush3.msra.mxu0 %v3359_v38  ;;  %4307 = vmatpush3.msra.mxu1 %v3379_v39  ;;  %v3443_v38 = vld [vmem:[%s6259_s4 + $0xa8] sm:$0xf]  ;;  %v1518_v39 = vld [vmem:[%s6259_s4 + $0x40] sm:$0xff] }
  0x6b   :  { %4272 = vmatprep.subr.mxu0 %v3358_v40  ;;  %4308 = vmatprep.subr.mxu1 %v3378_v41 }
  0x6c   :  { %4223 = vmatprep.mubr.msk.f32.mxu0 %vm92_vm0, %v580_v42  ;;  %4259 = vmatprep.mubr.msk.f32.mxu1 %vm92_vm0, %v580_v42  ;;  %v3442_v42 = vld [vmem:[%s6259_s4 + $0xa0] sm:$0xff] }
  0x6d   :  { %4273 = vmatpush3.msra.mxu0 %v3358_v40  ;;  %4309 = vmatpush3.msra.mxu1 %v3378_v41 }
  0x6e   :  { %4224 = vmatmul.mubr.msk.f32.gmra.mxu0 %vm92_vm0, %v581_v43  ;;  %4260 = vmatmul.mubr.msk.f32.gmra.mxu1 %vm92_vm0, %v581_v43  ;;  %v1517_v43 = vld [vmem:[%s6259_s4 + $0x38] sm:$0xff] }
  0x6f   :  { %4274 = vmatprep.subr.mxu0 %v3357_v44  ;;  %4310 = vmatprep.subr.mxu1 %v3377_v45 }
  0x70   :  { %4275 = vmatpush3.msra.mxu0 %v3357_v44  ;;  %4311 = vmatpush3.msra.mxu1 %v3377_v45  ;;  %v3441_v44 = vld [vmem:[%s6259_s4 + $0x98] sm:$0xff]  ;;  %v1516_v45 = vld [vmem:[%s6259_s4 + $0x30] sm:$0xff] }
  0x71   :  { %4276 = vmatprep.subr.mxu0 %v3356_v46  ;;  %4312 = vmatprep.subr.mxu1 %v3376_v47 }
  0x72   :  { %4277 = vmatpush3.msra.mxu0 %v3356_v46  ;;  %4313 = vmatpush3.msra.mxu1 %v3376_v47 }
  0x73   :  { %4278 = vmatprep.subr.mxu0 %v3355_v48  ;;  %4314 = vmatprep.subr.mxu1 %v3375_v49 }
  0x74   :  { %4279 = vmatpush3.msra.mxu0 %v3355_v48  ;;  %4315 = vmatpush3.msra.mxu1 %v3375_v49  ;;  %v3440_v48 = vld [vmem:[%s6259_s4 + $0x90] sm:$0xff]  ;;  %v1515_v49 = vld [vmem:[%s6259_s4 + $0x28] sm:$0xff] }
  0x75   :  { %4280 = vmatprep.subr.mxu0 %v3354_v50  ;;  %4316 = vmatprep.subr.mxu1 %v3374_v51 }
  0x76   :  { %4281 = vmatpush3.msra.mxu0 %v3354_v50  ;;  %4317 = vmatpush3.msra.mxu1 %v3374_v51  ;;  %v3439_v50 = vld [vmem:[%s6259_s4 + $0x88] sm:$0xff]  ;;  %v1514_v51 = vld [vmem:[%s6259_s4 + $0x20] sm:$0xff] }
  0x77   :  { %4282 = vmatprep.subr.mxu0 %v3353_v52  ;;  %4318 = vmatprep.subr.mxu1 %v3373_v53 }
  0x78   :  { %4283 = vmatpush3.msra.mxu0 %v3353_v52  ;;  %4319 = vmatpush3.msra.mxu1 %v3373_v53 }
  0x79   :  { %4284 = vmatprep.subr.mxu0 %v3352_v54  ;;  %4320 = vmatprep.subr.mxu1 %v3372_v55 }
  0x7a   :  { %4285 = vmatpush3.msra.mxu0 %v3352_v54  ;;  %4286 = vmatprep.mubr.msk.f32.mxu0 %vm92_vm0, %v858_v56  ;;  %v3438_v54 = vld [vmem:[%s6259_s4 + $0x80] sm:$0xff] }
  0x7b   :  { %4321 = vmatpush3.msra.mxu1 %v3372_v55  ;;  %4322 = vmatprep.mubr.msk.f32.mxu1 %vm92_vm0, %v858_v56  ;;  %v1513_v55 = vld [vmem:[%s6259_s4 + $0x18] sm:$0xff] }
  0x7c   :  { %4287 = vmatmul.mubr.msk.f32.vlgmr.msra.gmra.mxu0 %vm92_vm0, %v859_v57  ;;  %4323 = vmatmul.mubr.msk.f32.vlgmr.msra.gmra.mxu1 %vm92_vm0, %v859_v57  ;;  %v3437_v56 = vld [vmem:[%s6259_s4 + $0x78] sm:$0xff]  ;;  %v1512_v57 = vld [vmem:[%s6259_s4 + $0x10] sm:$0xff] }
  0x7d   :  { %4334 = vmatprep.subr.mxu0 %v3403_v58  ;;  %4370 = vmatprep.subr.mxu1 %v3423_v59 }
  0x7e   :  { %4335 = vmatpush3.msra.mxu0 %v3403_v58  ;;  %4371 = vmatpush3.msra.mxu1 %v3423_v59 }
  0x7f   :  { %4336 = vmatprep.subr.mxu0 %v3402_v60  ;;  %4372 = vmatprep.subr.mxu1 %v3422_v61 }
  0x80   :  { %4289 = vmatprep.mubr.msk.f32.mxu0 %vm92_vm0, %v860_v62  ;;  %4325 = vmatprep.mubr.msk.f32.mxu1 %vm92_vm0, %v860_v62  ;;  %v3435_v62 = vld [vmem:[%s6259_s4 + $0x68] sm:$0xff] }
  0x81   :  { %4337 = vmatpush3.msra.mxu0 %v3402_v60  ;;  %4373 = vmatpush3.msra.mxu1 %v3422_v61  ;;  %v3436_v60 = vld [vmem:[%s6259_s4 + $0x70] sm:$0xff]  ;;  %v1511_v61 = vld [vmem:[%s6259_s4 + $0x8] sm:$0xff] }
  0x82   :  { %4290 = vmatmul.mubr.msk.f32.gmra.mxu0 %vm92_vm0, %v861_v63  ;;  %4326 = vmatmul.mubr.msk.f32.gmra.mxu1 %vm92_vm0, %v861_v63  ;;  %v1510_v63 = vld [vmem:[%s6259_s4] sm:$0xff] }
  0x83   :  { %4338 = vmatprep.subr.mxu0 %v3401_v0  ;;  %4374 = vmatprep.subr.mxu1 %v3421_v1 }
  0x84   :  { %4339 = vmatpush3.msra.mxu0 %v3401_v0  ;;  %4375 = vmatpush3.msra.mxu1 %v3421_v1  ;;  %v3434_v0 = vld [vmem:[%s6259_s4 + $0x60] sm:$0xff] }
  0x85   :  { %4340 = vmatprep.subr.mxu0 %v3400_v2  ;;  %4376 = vmatprep.subr.mxu1 %v3420_v3 }
  0x86   :  { %4292 = vmatprep.mubr.msk.f32.mxu0 %vm92_vm0, %v862_v4  ;;  %4328 = vmatprep.mubr.msk.f32.mxu1 %vm92_vm0, %v862_v4 }
  0x87   :  { %4341 = vmatpush3.msra.mxu0 %v3400_v2  ;;  %4377 = vmatpush3.msra.mxu1 %v3420_v3  ;;  %v5626_v3 = vld [vmem:[%s6260_s5 + $0x50] sm:$0xf] }
  0x88   :  { %4293 = vmatmul.mubr.msk.f32.gmra.mxu0 %vm92_vm0, %v863_v5  ;;  %4329 = vmatmul.mubr.msk.f32.gmra.mxu1 %vm92_vm0, %v863_v5  ;;  %6269 = vst [vmem:[#allocation9_spill] sm:$0xff] %v5626_v3 }
  0x89   :  { %4342 = vmatprep.subr.mxu0 %v3399_v6  ;;  %4378 = vmatprep.subr.mxu1 %v3419_v7 }
  0x8a   :  { %4343 = vmatpush3.msra.mxu0 %v3399_v6  ;;  %4379 = vmatpush3.msra.mxu1 %v3419_v7  ;;  %v3433_v6 = vld [vmem:[%s6259_s4 + $0x58] sm:$0xff]  ;;  %v5638_v7 = vld [vmem:[%s6260_s5 + $0xa8] sm:$0xf] }
  0x8b   :  { %4344 = vmatprep.subr.mxu0 %v3398_v8  ;;  %4380 = vmatprep.subr.mxu1 %v3418_v9  ;;  %6271 = vst [vmem:[#allocation11_spill] sm:$0xff] %v5638_v7 }
  0x8c   :  { %4295 = vmatprep.mubr.msk.f32.mxu0 %vm92_vm0, %v864_v10  ;;  %4331 = vmatprep.mubr.msk.f32.mxu1 %vm92_vm0, %v864_v10 }
  0x8d   :  { %4345 = vmatpush3.msra.mxu0 %v3398_v8  ;;  %4381 = vmatpush3.msra.mxu1 %v3418_v9  ;;  %v4842_v8 = vmov 0.0  }
  0x8e   :  { %4296 = vmatmul.mubr.msk.f32.gmra.mxu0 %vm92_vm0, %v865_v11  ;;  %4332 = vmatmul.mubr.msk.f32.gmra.mxu1 %vm92_vm0, %v865_v11  ;;  %1505 = vst.msk [vmem:[#allocation3 + $0x20] sm:$0xff] %vm1473_vm2, %v4842_v8 }
  0x8f   :  { %4346 = vmatprep.subr.mxu0 %v3397_v12  ;;  %4382 = vmatprep.subr.mxu1 %v3417_v13  ;;  %2652 = vst.msk [vmem:[#allocation5 + $0x10] sm:$0xff] %vm2636_vm3, %v4842_v8 }
  0x90   :  { %4347 = vmatpush3.msra.mxu0 %v3397_v12  ;;  %4383 = vmatpush3.msra.mxu1 %v3417_v13 }
  0x91   :  { %4348 = vmatprep.subr.mxu0 %v3396_v14  ;;  %4384 = vmatprep.subr.mxu1 %v3416_v15 }
  0x92   :  { %4349 = vmatpush3.msra.mxu0 %v3396_v14  ;;  %4385 = vmatpush3.msra.mxu1 %v3416_v15 }
  0x93   :  { %4350 = vmatprep.subr.mxu0 %v3395_v16  ;;  %4386 = vmatprep.subr.mxu1 %v3415_v17 }
  0x94   :  { %4351 = vmatpush3.msra.mxu0 %v3395_v16  ;;  %4387 = vmatpush3.msra.mxu1 %v3415_v17 }
  0x95   :  { %4352 = vmatprep.subr.mxu0 %v3394_v18  ;;  %4388 = vmatprep.subr.mxu1 %v3414_v19 }
  0x96   :  { %4353 = vmatpush3.msra.mxu0 %v3394_v18  ;;  %4389 = vmatpush3.msra.mxu1 %v3414_v19 }
  0x97   :  { %4354 = vmatprep.subr.mxu0 %v3393_v20  ;;  %4390 = vmatprep.subr.mxu1 %v3413_v21 }
  0x98   :  { %4355 = vmatpush3.msra.mxu0 %v3393_v20  ;;  %4391 = vmatpush3.msra.mxu1 %v3413_v21 }
  0x99   :  { %4356 = vmatprep.subr.mxu0 %v3392_v22  ;;  %4392 = vmatprep.subr.mxu1 %v3412_v23 }
  0x9a   :  { %4357 = vmatpush3.msra.mxu0 %v3392_v22  ;;  %4358 = vmatprep.mubr.msk.f32.mxu0 %vm92_vm0, %v1142_v24 }
  0x9b   :  { %4393 = vmatpush3.msra.mxu1 %v3412_v23  ;;  %4394 = vmatprep.mubr.msk.f32.mxu1 %vm92_vm0, %v1142_v24 }
  0x9c   :  { %4359 = vmatmul.mubr.msk.f32.vlgmr.msra.gmra.mxu0 %vm92_vm0, %v1143_v25  ;;  %4395 = vmatmul.mubr.msk.f32.vlgmr.msra.gmra.mxu1 %vm92_vm0, %v1143_v25 }
  0x9d   :  { %4361 = vmatprep.mubr.msk.f32.mxu0 %vm92_vm0, %v1144_v26  ;;  %4397 = vmatprep.mubr.msk.f32.mxu1 %vm92_vm0, %v1144_v26 }
  0x9e   :  { %4434 = vmatprep.subr.msk.mxu1 %vm1560_vm1, %v1520_v34  ;;  %4406 = vmatprep.subr.msk.mxu0 %vm1560_vm1, %v3443_v38 }
  0x9f   :  { %4435 = vmatpush3.msk.msra.mxu1 %vm1560_vm1, %v1520_v34  ;;  %4407 = vmatpush3.msk.msra.mxu0 %vm1560_vm1, %v3443_v38 }
  0xa0   :  { %4362 = vmatmul.mubr.msk.f32.gmra.mxu0 %vm92_vm0, %v1145_v27  ;;  %4398 = vmatmul.mubr.msk.f32.gmra.mxu1 %vm92_vm0, %v1145_v27 }
  0xa1   :  { %4364 = vmatprep.mubr.msk.f32.mxu0 %vm92_vm0, %v1146_v28  ;;  %4400 = vmatprep.mubr.msk.f32.mxu1 %vm92_vm0, %v1146_v28 }
  0xa2   :  { %4436 = vmatprep.subr.mxu1 %v1519_v35  ;;  %4408 = vmatprep.subr.mxu0 %v3442_v42 }
  0xa3   :  { %4437 = vmatpush3.msra.mxu1 %v1519_v35  ;;  %4409 = vmatpush3.msra.mxu0 %v3442_v42 }
  0xa4   :  { %4365 = vmatmul.mubr.msk.f32.gmra.mxu0 %vm92_vm0, %v1147_v29  ;;  %4401 = vmatmul.mubr.msk.f32.gmra.mxu1 %vm92_vm0, %v1147_v29 }
  0xa5   :  { %4367 = vmatprep.mubr.msk.f32.mxu0 %vm92_vm0, %v1148_v30  ;;  %4403 = vmatprep.mubr.msk.f32.mxu1 %vm92_vm0, %v1148_v30 }
  0xa6   :  { %4438 = vmatprep.subr.mxu1 %v1518_v39  ;;  %4410 = vmatprep.subr.mxu0 %v3441_v44 }
  0xa7   :  { %4439 = vmatpush3.msra.mxu1 %v1518_v39  ;;  %4411 = vmatpush3.msra.mxu0 %v3441_v44 }
  0xa8   :  { %4368 = vmatmul.mubr.msk.f32.gmra.mxu0 %vm92_vm0, %v1149_v31  ;;  %4404 = vmatmul.mubr.msk.f32.gmra.mxu1 %vm92_vm0, %v1149_v31 }
  0xa9   :  { %4440 = vmatprep.subr.mxu1 %v1517_v43  ;;  %4412 = vmatprep.subr.mxu0 %v3440_v48 }
  0xaa   :  { %4441 = vmatpush3.msra.mxu1 %v1517_v43  ;;  %4413 = vmatpush3.msra.mxu0 %v3440_v48 }
  0xab   :  { %4442 = vmatprep.subr.mxu1 %v1516_v45  ;;  %4414 = vmatprep.subr.mxu0 %v3439_v50 }
  0xac   :  { %4443 = vmatpush3.msra.mxu1 %v1516_v45  ;;  %4415 = vmatpush3.msra.mxu0 %v3439_v50 }
  0xad   :  { %4444 = vmatprep.subr.mxu1 %v1515_v49  ;;  %4416 = vmatprep.subr.mxu0 %v3438_v54 }
  0xae   :  { %4445 = vmatpush3.msra.mxu1 %v1515_v49  ;;  %4417 = vmatpush3.msra.mxu0 %v3438_v54 }
  0xaf   :  { %4446 = vmatprep.subr.mxu1 %v1514_v51  ;;  %4418 = vmatprep.subr.mxu0 %v3437_v56 }
  0xb0   :  { %4447 = vmatpush3.msra.mxu1 %v1514_v51  ;;  %4419 = vmatpush3.msra.mxu0 %v3437_v56 }
  0xb1   :  { %4448 = vmatprep.subr.mxu1 %v1513_v55  ;;  %4420 = vmatprep.subr.mxu0 %v3436_v60 }
  0xb2   :  { %4449 = vmatpush3.msra.mxu1 %v1513_v55  ;;  %4421 = vmatpush3.msra.mxu0 %v3436_v60 }
  0xb3   :  { %4450 = vmatprep.subr.mxu1 %v1512_v57  ;;  %4422 = vmatprep.subr.mxu0 %v3435_v62 }
  0xb4   :  { %4451 = vmatpush3.msra.mxu1 %v1512_v57  ;;  %4423 = vmatpush3.msra.mxu0 %v3435_v62 }
  0xb5   :  { %4452 = vmatprep.subr.mxu1 %v1511_v61  ;;  %4424 = vmatprep.subr.mxu0 %v3434_v0 }
  0xb6   :  { %4453 = vmatpush3.msra.mxu1 %v1511_v61  ;;  %4425 = vmatpush3.msra.mxu0 %v3434_v0 }
  0xb7   :  { %4454 = vmatprep.subr.mxu1 %v1510_v63  ;;  %4426 = vmatprep.subr.mxu0 %v3433_v6 }
  0xb8   :  { %4455 = vmatpush3.msra.mxu1 %v1510_v63  ;;  %4427 = vmatpush3.msra.mxu0 %v3433_v6 }
  0xb9   :  { %4490 = vmatprep.subr.msk.mxu1 %vm1560_vm1, %v5626_v3  ;;  %4462 = vmatprep.subr.msk.mxu0 %vm1560_vm1, %v5638_v7 }
  0xdb   :  { %v5528_v32 = vpop.f32.mrf.mxu0 }
  0xdc   :  { %v5530_v33 = vpop.f32.mrf.mxu1 }
  0xdd   :  { %v5540_v36 = vpop.f32.mrf.mxu0  ;;  %v318_v6 = vadd.f32 %v5530_v33, %v5528_v32 }
  0xde   :  { %v5542_v37 = vpop.f32.mrf.mxu1 }
  0xdf   :  { %v313_v8 = vadd.f32 %v5542_v37, %v5540_v36 }
  0xe8   :  { %v5550_v40 = vpop.f32.mrf.mxu0 }
  0xe9   :  { %v5552_v41 = vpop.f32.mrf.mxu1 }
  0xea   :  { %v5568_v46 = vpop.f32.mrf.mxu0  ;;  %v328_v7 = vadd.f32 %v5552_v41, %v5550_v40 }
  0xeb   :  { %v5570_v47 = vpop.f32.mrf.mxu1 }
  0xec   :  { %v323_v3 = vadd.f32 %v5570_v47, %v5568_v46 }
  0xee   :  { %v5584_v52 = vpop.f32.mrf.mxu0 }
  0xef   :  { %v5586_v53 = vpop.f32.mrf.mxu1 }
  0xf0   :  { %v5600_v58 = vpop.f32.mrf.mxu0 }
  0xf1   :  { %v5602_v59 = vpop.f32.mrf.mxu1 }
  0xf4   :  { %v5619_v1 = vpop.f32.mrf.mxu0 }
  0xf5   :  { %v5621_v2 = vpop.f32.mrf.mxu1 }
  0xf6   :  { %v5630_v4 = vpop.f32.mrf.mxu0 }
  0xf7   :  { %6270 = vst [vmem:[#allocation10_spill] sm:$0xff] %v5630_v4  ;;  %v342_v5 = vpop.f32.mrf.mxu1  ;;  %v338_v4 = vadd.f32 %v5586_v53, %v5584_v52 }
  0xfc   :  { %v4144_v9 = vpop.f32.mrf.mxu0  ;;  %v4180_v10 = vpop.f32.mrf.mxu1 }
  0xfd   :  { %v541_v40 = vadd.f32 %v4180_v10, %v4144_v9 }
  0xfe   :  { %v430_v11 = vpop.f32.mrf.mxu0  ;;  %v535_v12 = vpop.f32.mrf.mxu1  ;;  %v6274_v32 = vld [vmem:[#allocation10_spill] sm:$0xff] }
  0xff   :  { %v343_v33 = vadd.f32 %v342_v5, %v6274_v32  ;;  %v536_v41 = vadd.f32 %v535_v12, %v430_v11 }
 0x109   :  { %v4147_v13 = vpop.f32.mrf.mxu0  ;;  %v4183_v14 = vpop.f32.mrf.mxu1 }
 0x10a   :  { %v551_v46 = vadd.f32 %v4183_v14, %v4147_v13 }
 0x10b   :  { %v440_v15 = vpop.f32.mrf.mxu0  ;;  %v545_v16 = vpop.f32.mrf.mxu1 }
 0x10c   :  { %v546_v47 = vadd.f32 %v545_v16, %v440_v15 }
 0x10f   :  { %v4150_v17 = vpop.f32.mrf.mxu0  ;;  %v4186_v18 = vpop.f32.mrf.mxu1 }
 0x110   :  { %v561_v52 = vadd.f32 %v4186_v18, %v4150_v17 }
 0x111   :  { %v450_v19 = vpop.f32.mrf.mxu0  ;;  %v555_v20 = vpop.f32.mrf.mxu1 }
 0x112   :  { %v556_v53 = vadd.f32 %v555_v20, %v450_v19 }
 0x115   :  { %v4153_v21 = vpop.f32.mrf.mxu0  ;;  %v4189_v22 = vpop.f32.mrf.mxu1 }
 0x117   :  { %v460_v23 = vpop.f32.mrf.mxu0  ;;  %v565_v24 = vpop.f32.mrf.mxu1 }
 0x11c   :  { %v4216_v25 = vpop.f32.mrf.mxu0  ;;  %v4252_v26 = vpop.f32.mrf.mxu1 }
 0x11e   :  { %v685_v27 = vpop.f32.mrf.mxu0  ;;  %v811_v28 = vpop.f32.mrf.mxu1 }
 0x11f   :  { %v724_v5 = vadd.f32 %v685_v27, %v313_v8  ;;  %v850_v32 = vadd.f32 %v811_v28, %v536_v41 }
 0x122   :  { %v4219_v29 = vpop.f32.mrf.mxu0  ;;  %v4255_v30 = vpop.f32.mrf.mxu1 }
 0x124   :  { %v695_v31 = vpop.f32.mrf.mxu0  ;;  %v821_v34 = vpop.f32.mrf.mxu1 }
 0x125   :  { %v726_v9 = vadd.f32 %v695_v31, %v323_v3  ;;  %v852_v10 = vadd.f32 %v821_v34, %v546_v47 }
 0x128   :  { %v4222_v35 = vpop.f32.mrf.mxu0  ;;  %v4258_v38 = vpop.f32.mrf.mxu1 }
 0x129   :  { %v729_v13 = vadd.f32 %v4222_v35, %v338_v4  ;;  %v855_v14 = vadd.f32 %v4258_v38, %v561_v52 }
 0x12a   :  { %v705_v39 = vpop.f32.mrf.mxu0  ;;  %v831_v42 = vpop.f32.mrf.mxu1 }
 0x12b   :  { %v854_v18 = vadd.f32 %v831_v42, %v556_v53 }
 0x12e   :  { %v4225_v43 = vpop.f32.mrf.mxu0  ;;  %v4261_v44 = vpop.f32.mrf.mxu1 }
 0x130   :  { %v715_v45 = vpop.f32.mrf.mxu0  ;;  %v841_v48 = vpop.f32.mrf.mxu1 }
 0x13c   :  { %v4288_v49 = vpop.f32.mrf.mxu0  ;;  %v4324_v50 = vpop.f32.mrf.mxu1 }
 0x13e   :  { %v969_v51 = vpop.f32.mrf.mxu0  ;;  %v1095_v54 = vpop.f32.mrf.mxu1 }
 0x142   :  { %v4291_v55 = vpop.f32.mrf.mxu0  ;;  %v4327_v56 = vpop.f32.mrf.mxu1 }
 0x144   :  { %v979_v57 = vpop.f32.mrf.mxu0  ;;  %v1105_v60 = vpop.f32.mrf.mxu1 }
 0x145   :  { %v1136_v42 = vadd.f32 %v1105_v60, %v852_v10 }
 0x148   :  { %v4294_v61 = vpop.f32.mrf.mxu0  ;;  %v4330_v62 = vpop.f32.mrf.mxu1 }
 0x14a   :  { %v5644_v63 = vpop.f32.mrf.mxu0  ;;  %v5646_v0 = vpop.f32.mrf.mxu1 }
 0x14b   :  { %6272 = vst [vmem:[#allocation12_spill] sm:$0xff] %v5644_v63  ;;  %6273 = vst [vmem:[#allocation13_spill] sm:$0xff] %v5646_v0  ;;  %v333_v63 = vadd.f32 %v5602_v59, %v5600_v58  ;;  %v348_v0 = vadd.f32 %v5621_v2, %v5619_v1  ;;  %v571_v58 = vadd.f32 %v4189_v22, %v4153_v21 }
 0x14c   :  { %v566_v59 = vadd.f32 %v565_v24, %v460_v23  ;;  %v725_v1 = vadd.f32 %v4216_v25, %v318_v6  ;;  %v851_v2 = vadd.f32 %v4252_v26, %v541_v40  ;;  %v1008_v22 = vadd.f32 %v969_v51, %v724_v5 }
 0x14d   :  { %v728_v17 = vadd.f32 %v705_v39, %v333_v63  ;;  %v731_v19 = vadd.f32 %v4225_v43, %v348_v0  ;;  %v857_v20 = vadd.f32 %v4261_v44, %v571_v58  ;;  %v1134_v23 = vadd.f32 %v1095_v54, %v850_v32 }
 0x14e   :  { %v5663_v36 = vpop.f32.mrf.mxu0  ;;  %v5665_v37 = vpop.f32.mrf.mxu1  ;;  %v1009_v15 = vadd.f32 %v4288_v49, %v725_v1  ;;  %v1135_v16 = vadd.f32 %v4324_v50, %v851_v2  ;;  %v730_v26 = vadd.f32 %v715_v45, %v343_v33  ;;  %v856_v4 = vadd.f32 %v841_v48, %v566_v59 }
 0x14f   :  { %6275 = vst [vmem:[#allocation10_spill] sm:$0xff] %v5663_v36  ;;  %6276 = vst [vmem:[#allocation14_spill] sm:$0xff] %v5665_v37  ;;  %v727_v36 = vadd.f32 %v4219_v29, %v328_v7  ;;  %v853_v37 = vadd.f32 %v4255_v30, %v551_v46  ;;  %v5674_v7 = vld [vmem:[%s6258_s3] ss:$0 sm:$0xff]  ;;  %v1010_v39 = vadd.f32 %v979_v57, %v726_v9 }
 0x150   :  { %v5667_v11 = vpop.f32.mrf.mxu0  ;;  %v5669_v12 = vpop.f32.mrf.mxu1  ;;  %v1013_v43 = vadd.f32 %v4294_v61, %v729_v13  ;;  %v1139_v44 = vadd.f32 %v4330_v62, %v855_v14 }
 0x151   :  { %v1011_v27 = vadd.f32 %v4291_v55, %v727_v36  ;;  %v1137_v28 = vadd.f32 %v4327_v56, %v853_v37 }
 0x152   :  { %v6277_v55 = vld [vmem:[#allocation12_spill] sm:$0xff]  ;;  %v6278_v63 = vld [vmem:[#allocation13_spill] sm:$0xff] }
 0x153   :  { %v1012_v56 = vadd.f32 %v6277_v55, %v728_v17  ;;  %v1138_v0 = vadd.f32 %v6278_v63, %v854_v18 }
 0x156   :  { %v6279_v37 = vld [vmem:[#allocation10_spill] sm:$0xff] }
 0x157   :  { %v1015_v40 = vadd.f32 %v6279_v37, %v731_v19  ;;  %v6280_v5 = vld [vmem:[#allocation14_spill] sm:$0xff] }
 0x158   :  { %v1141_v32 = vadd.f32 %v6280_v5, %v857_v20  ;;  %v1528_v5 = vld [vmem:[%s6260_s5 + $0x38] sm:$0xff] }
 0x15c   :  { %v4360_v21 = vpop.f32.mrf.mxu0  ;;  %v4396_v3 = vpop.f32.mrf.mxu1 }
 0x15d   :  { %v1293_v24 = vadd.f32 %v4360_v21, %v1009_v15  ;;  %v1419_v25 = vadd.f32 %v4396_v3, %v1135_v16  ;;  %v1014_v21 = vadd.f32 %v5667_v11, %v730_v26 }
 0x15e   :  { %v1253_v29 = vpop.f32.mrf.mxu0  ;;  %v1379_v30 = vpop.f32.mrf.mxu1 }
 0x15f   :  { %v1434_v31 = vadd.f32 %v5674_v7, %v1293_v24  ;;  %v1450_v34 = vadd.f32 %v5674_v7, %v1419_v25  ;;  %v1292_v35 = vadd.f32 %v1253_v29, %v1008_v22  ;;  %v1418_v38 = vadd.f32 %v1379_v30, %v1134_v23 }
 0x160   :  { %v4363_v49 = vpop.f32.mrf.mxu0  ;;  %v4399_v50 = vpop.f32.mrf.mxu1  ;;  %v1140_v30 = vadd.f32 %v5669_v12, %v856_v4 }
 0x161   :  { %v1442_v51 = vmax.f32 %v1434_v31, 0.0  ;;  %v1458_v54 = vmax.f32 %v1450_v34, 0.0  ;;  %v1433_v45 = vadd.f32 %v5674_v7, %v1292_v35  ;;  %v1449_v48 = vadd.f32 %v5674_v7, %v1418_v38 }
 0x162   :  { %v1295_v6 = vadd.f32 %v4363_v49, %v1011_v27  ;;  %v1421_v8 = vadd.f32 %v4399_v50, %v1137_v28  ;;  %v1263_v33 = vpop.f32.mrf.mxu0  ;;  %v1389_v36 = vpop.f32.mrf.mxu1 }
 0x163   :  { %v1466_v57 = vmax.f32 %v1442_v51, %v1458_v54  ;;  %v1441_v60 = vmax.f32 %v1433_v45, 0.0  ;;  %v1457_v61 = vmax.f32 %v1449_v48, 0.0  ;;  %v1294_v62 = vadd.f32 %v1263_v33, %v1010_v39 }
 0x164   :  { %v1436_v41 = vadd.f32 %v5674_v7, %v1295_v6  ;;  %v1452_v46 = vadd.f32 %v5674_v7, %v1421_v8  ;;  %v1420_v47 = vadd.f32 %v1389_v36, %v1136_v42  ;;  %v4366_v52 = vpop.f32.mrf.mxu0  ;;  %v4402_v53 = vpop.f32.mrf.mxu1 }
 0x165   :  { %1475 = vst.msk [vmem:[#allocation2 + $0x8] sm:$0xff] %vm1473_vm2, %v1466_v57  ;;  %v1465_v58 = vmax.f32 %v1441_v60, %v1457_v61  ;;  %v1435_v59 = vadd.f32 %v5674_v7, %v1294_v62  ;;  %v1297_v1 = vadd.f32 %v4366_v52, %v1013_v43  ;;  %v1423_v2 = vadd.f32 %v4402_v53, %v1139_v44  ;;  %v1530_v52 = vld [vmem:[%s6260_s5 + $0x48] sm:$0xff] }
 0x166   :  { %v1444_v9 = vmax.f32 %v1436_v41, 0.0  ;;  %v1460_v10 = vmax.f32 %v1452_v46, 0.0  ;;  %v1451_v13 = vadd.f32 %v5674_v7, %v1420_v47  ;;  %v1273_v14 = vpop.f32.mrf.mxu0  ;;  %v1399_v15 = vpop.f32.mrf.mxu1  ;;  %v6281_v53 = vld [vmem:[#allocation9_spill] sm:$0xff] }
 0x167   :  { %1474 = vst.msk [vmem:[#allocation2] sm:$0xff] %vm1473_vm2, %v1465_v58  ;;  %v1443_v16 = vmax.f32 %v1435_v59, 0.0  ;;  %v1438_v17 = vadd.f32 %v5674_v7, %v1297_v1  ;;  %v1454_v18 = vadd.f32 %v5674_v7, %v1423_v2  ;;  %v1296_v19 = vadd.f32 %v1273_v14, %v1012_v56  ;;  %v1529_v58 = vld [vmem:[%s6260_s5 + $0x40] sm:$0xff] }
 0x168   :  { %v1468_v3 = vmax.f32 %v1444_v9, %v1460_v10  ;;  %v1459_v22 = vmax.f32 %v1451_v13, 0.0  ;;  %v1422_v23 = vadd.f32 %v1399_v15, %v1138_v0  ;;  %v4369_v20 = vpop.f32.mrf.mxu0  ;;  %v4405_v24 = vpop.f32.mrf.mxu1  ;;  %v3463_v2 = vld [vmem:[%s6260_s5 + $0xa0] sm:$0xff]  ;;  %v3462_v9 = vld [vmem:[%s6260_s5 + $0x98] sm:$0xff]  ;;  %v1527_v10 = vld [vmem:[%s6260_s5 + $0x30] sm:$0xff] }
 0x169   :  { %v1446_v25 = vmax.f32 %v1438_v17, 0.0  ;;  %v1462_v27 = vmax.f32 %v1454_v18, 0.0  ;;  %v1437_v28 = vadd.f32 %v5674_v7, %v1296_v19  ;;  %v1299_v29 = vadd.f32 %v4369_v20, %v1015_v40  ;;  %v1526_v17 = vld [vmem:[%s6260_s5 + $0x28] sm:$0xff]  ;;  %v1525_v19 = vld [vmem:[%s6260_s5 + $0x20] sm:$0xff]  ;;  %v3457_v20 = vld [vmem:[%s6260_s5 + $0x70] sm:$0xff] }
 0x16a   :  { %1477 = vst.msk [vmem:[#allocation2 + $0x18] sm:$0xff] %vm1473_vm2, %v1468_v3  ;;  %v1467_v31 = vmax.f32 %v1443_v16, %v1459_v22  ;;  %v1453_v34 = vadd.f32 %v5674_v7, %v1422_v23  ;;  %v1425_v35 = vadd.f32 %v4405_v24, %v1141_v32  ;;  %v1283_v38 = vpop.f32.mrf.mxu0  ;;  %v1409_v11 = vpop.f32.mrf.mxu1  ;;  %v6282_v32 = vld [vmem:[#allocation11_spill] sm:$0xff]  ;;  %v3460_v18 = vld [vmem:[%s6260_s5 + $0x88] sm:$0xff] }
 0x16b   :  { %v1470_v26 = vmax.f32 %v1446_v25, %v1462_v27  ;;  %v1445_v39 = vmax.f32 %v1437_v28, 0.0  ;;  %v1440_v42 = vadd.f32 %v5674_v7, %v1299_v29  ;;  %v1298_v43 = vadd.f32 %v1283_v38, %v1014_v21  ;;  %v3461_v16 = vld [vmem:[%s6260_s5 + $0x90] sm:$0xff]  ;;  %v3459_v21 = vld [vmem:[%s6260_s5 + $0x80] sm:$0xff]  ;;  %v1524_v3 = vld [vmem:[%s6260_s5 + $0x18] sm:$0xff] }
 0x16c   :  { %1476 = vst.msk [vmem:[#allocation2 + $0x10] sm:$0xff] %vm1473_vm2, %v1467_v31  ;;  %v1461_v44 = vmax.f32 %v1453_v34, 0.0  ;;  %v1456_v49 = vadd.f32 %v5674_v7, %v1425_v35  ;;  %v1424_v50 = vadd.f32 %v1409_v11, %v1140_v30  ;;  %v3458_v22 = vld [vmem:[%s6260_s5 + $0x78] sm:$0xff]  ;;  %v1523_v23 = vld [vmem:[%s6260_s5 + $0x10] sm:$0xff]  ;;  %v1522_v24 = vld [vmem:[%s6260_s5 + $0x8] sm:$0xff] }
 0x16d   :  { %1479 = vst.msk [vmem:[#allocation2 + $0x28] sm:$0xff] %vm1473_vm2, %v1470_v26  ;;  %v1448_v12 = vmax.f32 %v1440_v42, 0.0  ;;  %v1439_v4 = vadd.f32 %v5674_v7, %v1298_v43  ;;  %v3456_v25 = vld [vmem:[%s6260_s5 + $0x68] sm:$0xff]  ;;  %v1521_v27 = vld [vmem:[%s6260_s5] sm:$0xff]  ;;  %v3454_v30 = vld [vmem:[%s6260_s5 + $0x58] sm:$0xff] }
 0x16e   :  { %v1469_v51 = vmax.f32 %v1445_v39, %v1461_v44  ;;  %v1464_v54 = vmax.f32 %v1456_v49, 0.0  ;;  %v1455_v45 = vadd.f32 %v5674_v7, %v1424_v50  ;;  %v1482_v48 = vld [vmem:[#allocation2] ss:$2 sm:$0xff]  ;;  %v1490_v55 = vld [vmem:[#allocation2 + $0x1] ss:$2 sm:$0xff]  ;;  %v3500_v31 = vld [vmem:[%s6260_s5 + $0xf8] sm:$0xff] }
 0x16f   :  { %v1447_v56 = vmax.f32 %v1439_v4, 0.0  ;;  %v1497_v63 = vmax.f32 %v1482_v48, %v1490_v55  ;;  %v3455_v28 = vld [vmem:[%s6260_s5 + $0x60] sm:$0xff]  ;;  %v3499_v35 = vld [vmem:[%s6260_s5 + $0xf0] sm:$0xff]  ;;  %v3484_v38 = vld [vmem:[%s6259_s4 + $0xf8] sm:$0xff] }
 0x170   :  { %1478 = vst.msk [vmem:[#allocation2 + $0x20] sm:$0xff] %vm1473_vm2, %v1469_v51  ;;  %v1472_v0 = vmax.f32 %v1448_v12, %v1464_v54  ;;  %v1463_v6 = vmax.f32 %v1455_v45, 0.0  ;;  %v3501_v29 = vld [vmem:[%s6260_s5 + $0x100] sm:$0xf]  ;;  %v3498_v11 = vld [vmem:[%s6260_s5 + $0xe8] sm:$0xff]  ;;  %v3483_v39 = vld [vmem:[%s6259_s4 + $0xf0] sm:$0xff] }
 0x171   :  { %1501 = vst.msk [vmem:[#allocation3] sm:$0xff] %vm1473_vm2, %v1497_v63  ;;  %v3485_v34 = vld [vmem:[%s6259_s4 + $0x100] sm:$0xf]  ;;  %v3482_v43 = vld [vmem:[%s6259_s4 + $0xe8] sm:$0xff]  ;;  %v3496_v44 = vld [vmem:[%s6260_s5 + $0xd8] sm:$0xff] }
 0x172   :  { %1481 = vst.msk [vmem:[#allocation2 + $0x38] sm:$0xff] %vm1473_vm2, %v1472_v0  ;;  %v1471_v8 = vmax.f32 %v1447_v56, %v1463_v6  ;;  %v3497_v42 = vld [vmem:[%s6260_s5 + $0xe0] sm:$0xff]  ;;  %v3495_v50 = vld [vmem:[%s6260_s5 + $0xd0] sm:$0xff]  ;;  %v3480_v12 = vld [vmem:[%s6259_s4 + $0xd8] sm:$0xff] }
 0x173   :  { %v1484_v33 = vld [vmem:[#allocation2 + $0x10] ss:$2 sm:$0xff]  ;;  %v1492_v36 = vld [vmem:[#allocation2 + $0x11] ss:$2 sm:$0xff]  ;;  %v3481_v49 = vld [vmem:[%s6259_s4 + $0xe0] sm:$0xff] }
 0x174   :  { %1480 = vst.msk [vmem:[#allocation2 + $0x30] sm:$0xff] %vm1473_vm2, %v1471_v8  ;;  %v1498_v57 = vmax.f32 %v1484_v33, %v1492_v36  ;;  %v3494_v4 = vld [vmem:[%s6260_s5 + $0xc8] sm:$0xff]  ;;  %v3479_v51 = vld [vmem:[%s6259_s4 + $0xd0] sm:$0xff]  ;;  %v3493_v54 = vld [vmem:[%s6260_s5 + $0xc0] sm:$0xff] }
 0x175   :  { %v3478_v45 = vld [vmem:[%s6259_s4 + $0xc8] sm:$0xff]  ;;  %v3492_v48 = vld [vmem:[%s6260_s5 + $0xb8] sm:$0xff]  ;;  %v3477_v55 = vld [vmem:[%s6259_s4 + $0xc0] sm:$0xff] }
 0x176   :  { %1502 = vst.msk [vmem:[#allocation3 + $0x8] sm:$0xff] %vm1473_vm2, %v1498_v57  ;;  %v3491_v56 = vld [vmem:[%s6260_s5 + $0xb0] sm:$0xff]  ;;  %v3476_v63 = vld [vmem:[%s6259_s4 + $0xb8] sm:$0xff] }
 0x177   :  { %v1486_v7 = vld [vmem:[#allocation2 + $0x20] ss:$2 sm:$0xff]  ;;  %v1494_v60 = vld [vmem:[#allocation2 + $0x21] ss:$2 sm:$0xff]  ;;  %v3533_v0 = vld [vmem:[%s6260_s5 + $0x158] sm:$0xf] }
 0x178   :  { %v1499_v61 = vmax.f32 %v1486_v7, %v1494_v60  ;;  %v1506_v62 = vld [vmem:[#allocation3] sm:$0xff]  ;;  %v3475_v8 = vld [vmem:[%s6259_s4 + $0xb0] sm:$0xff]  ;;  %v3517_v57 = vld [vmem:[%s6259_s4 + $0x158] sm:$0xf] }
 0x179   :  { %4456 = vmatprep.mubr.msk.f32.mxu1 %vm1473_vm2, %v1506_v62  ;;  %v3532_v33 = vld [vmem:[%s6260_s5 + $0x150] sm:$0xff]  ;;  %v3531_v7 = vld [vmem:[%s6260_s5 + $0x148] sm:$0xff] }
 0x17a   :  { %1503 = vst.msk [vmem:[#allocation3 + $0x10] sm:$0xff] %vm1473_vm2, %v1499_v61  ;;  %v3516_v61 = vld [vmem:[%s6259_s4 + $0x150] sm:$0xff] }
 0x17b   :  { %v1488_v37 = vld [vmem:[#allocation2 + $0x30] ss:$2 sm:$0xff]  ;;  %v1496_v40 = vld [vmem:[#allocation2 + $0x31] ss:$2 sm:$0xff] }
 0x17c   :  { %v1500_v41 = vmax.f32 %v1488_v37, %v1496_v40  ;;  %v3515_v40 = vld [vmem:[%s6259_s4 + $0x148] sm:$0xff] }
 0x17d   :  { %v1532_v46 = vld [vmem:[#allocation3 + $0x1] sm:$0xff] }
 0x17e   :  { %v5710_v47 = vld [vmem:[#allocation3 + $0x8] sm:$0xff]  ;;  %4428 = vmatprep.mubr.msk.f32.mxu0 %vm1473_vm2, %v1532_v46  ;;  %1504 = vst.msk [vmem:[#allocation3 + $0x18] sm:$0xff] %vm1473_vm2, %v1500_v41  ;;  %v3529_v41 = vld [vmem:[%s6260_s5 + $0x138] sm:$0xff] }
 0x17f   :  { %4457 = vmatmul.mubr.msk.f32.vlgmr.msra.gmra.mxu1 %vm1473_vm2, %v5710_v47  ;;  %v1937_v26 = vld [vmem:[#allocation3 + $0x2] sm:$0xff] }
 0x180   :  { %4491 = vmatpush3.msk.msra.mxu1 %vm1560_vm1, %v6281_v53  ;;  %v2161_v37 = vld [vmem:[#allocation3 + $0x3] sm:$0xff] }
 0x181   :  { %4492 = vmatprep.subr.mxu1 %v1530_v52  ;;  %v5724_v59 = vld [vmem:[#allocation3 + $0x9] sm:$0xff] }
 0x182   :  { %4493 = vmatpush3.msra.mxu1 %v1530_v52  ;;  %v5726_v1 = vld [vmem:[#allocation3 + $0x10] sm:$0xff]  ;;  %4429 = vmatmul.mubr.msk.f32.vlgmr.msra.gmra.mxu0 %vm1473_vm2, %v5724_v59  ;;  %v3513_v52 = vld [vmem:[%s6259_s4 + $0x138] sm:$0xff]  ;;  %v3527_v53 = vld [vmem:[%s6260_s5 + $0x128] sm:$0xff] }
 0x183   :  { %4494 = vmatprep.subr.mxu1 %v1529_v58  ;;  %4459 = vmatprep.mubr.msk.f32.mxu1 %vm1473_vm2, %v5726_v1  ;;  %v1938_v6 = vld [vmem:[#allocation3 + $0xa] sm:$0xff] }
 0x184   :  { %4463 = vmatpush3.msk.msra.mxu0 %vm1560_vm1, %v6282_v32  ;;  %4495 = vmatpush3.msra.mxu1 %v1529_v58  ;;  %v3512_v58 = vld [vmem:[%s6259_s4 + $0x130] sm:$0xff] }
 0x185   :  { %4464 = vmatprep.subr.mxu0 %v3463_v2  ;;  %4496 = vmatprep.subr.mxu1 %v1528_v5  ;;  %v5746_v13 = vld [vmem:[#allocation3 + $0x11] sm:$0xff]  ;;  %v5750_v15 = vld [vmem:[#allocation3 + $0x19] sm:$0xff] }
 0x186   :  { %4465 = vmatpush3.msra.mxu0 %v3463_v2  ;;  %v5748_v14 = vld [vmem:[#allocation3 + $0x18] sm:$0xff]  ;;  %4497 = vmatpush3.msra.mxu1 %v1528_v5  ;;  %v3510_v5 = vld [vmem:[%s6259_s4 + $0x120] sm:$0xff]  ;;  %v3524_v32 = vld [vmem:[%s6260_s5 + $0x110] sm:$0xff] }
 0x187   :  { %4466 = vmatprep.subr.mxu0 %v3462_v9  ;;  %4498 = vmatprep.subr.mxu1 %v1527_v10  ;;  %v1939_v36 = vld [vmem:[#allocation3 + $0x12] sm:$0xff]  ;;  %v1940_v60 = vld [vmem:[#allocation3 + $0x1a] sm:$0xff] }
 0x188   :  { %4431 = vmatprep.mubr.msk.f32.mxu0 %vm1473_vm2, %v5746_v13  ;;  %4460 = vmatmul.mubr.msk.f32.gmra.mxu1 %vm1473_vm2, %v5748_v14  ;;  %v3525_v2 = vld [vmem:[%s6260_s5 + $0x118] sm:$0xff] }
 0x189   :  { %4467 = vmatpush3.msra.mxu0 %v3462_v9  ;;  %4499 = vmatpush3.msra.mxu1 %v1527_v10  ;;  %v3509_v9 = vld [vmem:[%s6259_s4 + $0x118] sm:$0xff]  ;;  %v3523_v10 = vld [vmem:[%s6260_s5 + $0x108] sm:$0xff] }
 0x18a   :  { %4432 = vmatmul.mubr.msk.f32.gmra.mxu0 %vm1473_vm2, %v5750_v15  ;;  %4468 = vmatprep.subr.mxu0 %v3461_v16 }
 0x18b   :  { %4500 = vmatprep.subr.mxu1 %v1526_v17  ;;  %4512 = vmatprep.mubr.msk.f32.mxu1 %vm1473_vm2, %v1506_v62  ;;  %v3530_v62 = vld [vmem:[%s6260_s5 + $0x140] sm:$0xff] }
 0x18c   :  { %4469 = vmatpush3.msra.mxu0 %v3461_v16  ;;  %4484 = vmatprep.mubr.msk.f32.mxu0 %vm1473_vm2, %v1532_v46  ;;  %v3514_v46 = vld [vmem:[%s6259_s4 + $0x140] sm:$0xff]  ;;  %v3507_v16 = vld [vmem:[%s6259_s4 + $0x108] sm:$0xff] }
 0x18d   :  { %4501 = vmatpush3.msra.mxu1 %v1526_v17  ;;  %4470 = vmatprep.subr.mxu0 %v3460_v18  ;;  %v3564_v17 = vld [vmem:[%s6260_s5 + $0x1a8] sm:$0xff] }
 0x18e   :  { %4502 = vmatprep.subr.mxu1 %v1525_v19  ;;  %4471 = vmatpush3.msra.mxu0 %v3460_v18  ;;  %v2163_v18 = vld [vmem:[#allocation3 + $0x13] sm:$0xff] }
 0x18f   :  { %4503 = vmatpush3.msra.mxu1 %v1525_v19  ;;  %4472 = vmatprep.subr.mxu0 %v3459_v21  ;;  %v3549_v19 = vld [vmem:[%s6259_s4 + $0x1b0] sm:$0xf] }
 0x190   :  { %4504 = vmatprep.subr.mxu1 %v1524_v3  ;;  %4473 = vmatpush3.msra.mxu0 %v3459_v21  ;;  %v3563_v21 = vld [vmem:[%s6260_s5 + $0x1a0] sm:$0xff] }
 0x191   :  { %4505 = vmatpush3.msra.mxu1 %v1524_v3  ;;  %4474 = vmatprep.subr.mxu0 %v3458_v22  ;;  %v2164_v3 = vld [vmem:[#allocation3 + $0x1b] sm:$0xff] }
 0x192   :  { %4506 = vmatprep.subr.mxu1 %v1523_v23  ;;  %4475 = vmatpush3.msra.mxu0 %v3458_v22  ;;  %v3548_v22 = vld [vmem:[%s6259_s4 + $0x1a8] sm:$0xff] }
 0x193   :  { %4507 = vmatpush3.msra.mxu1 %v1523_v23  ;;  %4476 = vmatprep.subr.mxu0 %v3457_v20  ;;  %v3562_v23 = vld [vmem:[%s6260_s5 + $0x198] sm:$0xff] }
 0x194   :  { %4508 = vmatprep.subr.mxu1 %v1522_v24  ;;  %4477 = vmatpush3.msra.mxu0 %v3457_v20  ;;  %v2385_v20 = vld [vmem:[#allocation3 + $0x4] sm:$0xff] }
 0x195   :  { %4509 = vmatpush3.msra.mxu1 %v1522_v24  ;;  %4478 = vmatprep.subr.mxu0 %v3456_v25  ;;  %v3547_v24 = vld [vmem:[%s6259_s4 + $0x1a0] sm:$0xff] }
 0x196   :  { %4510 = vmatprep.subr.mxu1 %v1521_v27  ;;  %4479 = vmatpush3.msra.mxu0 %v3456_v25  ;;  %v3561_v25 = vld [vmem:[%s6260_s5 + $0x190] sm:$0xff] }
 0x197   :  { %4511 = vmatpush3.msra.mxu1 %v1521_v27  ;;  %4480 = vmatprep.subr.mxu0 %v3455_v28  ;;  %v3546_v27 = vld [vmem:[%s6259_s4 + $0x198] sm:$0xff] }
 0x198   :  { %4513 = vmatmul.mubr.msk.f32.vlgmr.msra.gmra.mxu1 %vm1473_vm2, %v5710_v47  ;;  %4546 = vmatprep.subr.msk.mxu1 %vm1560_vm1, %v3501_v29  ;;  %v3528_v47 = vld [vmem:[%s6260_s5 + $0x130] sm:$0xff] }
 0x199   :  { %4481 = vmatpush3.msra.mxu0 %v3455_v28  ;;  %4515 = vmatprep.mubr.msk.f32.mxu1 %vm1473_vm2, %v5726_v1  ;;  %v3511_v1 = vld [vmem:[%s6259_s4 + $0x128] sm:$0xff] }
 0x19a   :  { %4547 = vmatpush3.msk.msra.mxu1 %vm1560_vm1, %v3501_v29  ;;  %4482 = vmatprep.subr.mxu0 %v3454_v30  ;;  %v3560_v28 = vld [vmem:[%s6260_s5 + $0x188] sm:$0xff]  ;;  %v3545_v29 = vld [vmem:[%s6259_s4 + $0x190] sm:$0xff] }
 0x19b   :  { %4548 = vmatprep.subr.mxu1 %v3500_v31  ;;  %4483 = vmatpush3.msra.mxu0 %v3454_v30  ;;  %v3559_v30 = vld [vmem:[%s6260_s5 + $0x180] sm:$0xff] }
 0x19c   :  { %4549 = vmatpush3.msra.mxu1 %v3500_v31  ;;  %4485 = vmatmul.mubr.msk.f32.vlgmr.msra.gmra.mxu0 %vm1473_vm2, %v5724_v59  ;;  %v3526_v59 = vld [vmem:[%s6260_s5 + $0x120] sm:$0xff]  ;;  %v3544_v31 = vld [vmem:[%s6259_s4 + $0x188] sm:$0xff] }
 0x19d   :  { %4516 = vmatmul.mubr.msk.f32.gmra.mxu1 %vm1473_vm2, %v5748_v14  ;;  %4518 = vmatprep.subr.msk.mxu0 %vm1560_vm1, %v3485_v34  ;;  %v3565_v14 = vld [vmem:[%s6260_s5 + $0x1b0] sm:$0xf] }
 0x19e   :  { %4550 = vmatprep.subr.mxu1 %v3499_v35  ;;  %4487 = vmatprep.mubr.msk.f32.mxu0 %vm1473_vm2, %v5746_v13  ;;  %v3508_v13 = vld [vmem:[%s6259_s4 + $0x110] sm:$0xff] }
 0x19f   :  { %4519 = vmatpush3.msk.msra.mxu0 %vm1560_vm1, %v3485_v34  ;;  %4551 = vmatpush3.msra.mxu1 %v3499_v35  ;;  %v3558_v34 = vld [vmem:[%s6260_s5 + $0x178] sm:$0xff]  ;;  %v3543_v35 = vld [vmem:[%s6259_s4 + $0x180] sm:$0xff] }
 0x1a0   :  { %4568 = vmatprep.mubr.msk.f32.mxu1 %vm1473_vm2, %v1937_v26  ;;  %4520 = vmatprep.subr.mxu0 %v3484_v38 }
 0x1a1   :  { %4552 = vmatprep.subr.mxu1 %v3498_v11  ;;  %4521 = vmatpush3.msra.mxu0 %v3484_v38  ;;  %v3557_v38 = vld [vmem:[%s6260_s5 + $0x170] sm:$0xff] }
 0x1a2   :  { %4553 = vmatpush3.msra.mxu1 %v3498_v11  ;;  %4488 = vmatmul.mubr.msk.f32.gmra.mxu0 %vm1473_vm2, %v5750_v15  ;;  %v2162_v15 = vld [vmem:[#allocation3 + $0xb] sm:$0xff]  ;;  %v3542_v11 = vld [vmem:[%s6259_s4 + $0x178] sm:$0xff] }
 0x1a3   :  { %4522 = vmatprep.subr.mxu0 %v3483_v39  ;;  %4554 = vmatprep.subr.mxu1 %v3497_v42 }
 0x1a4   :  { %4523 = vmatpush3.msra.mxu0 %v3483_v39  ;;  %4540 = vmatprep.mubr.msk.f32.mxu0 %vm1473_vm2, %v1937_v26  ;;  %v3556_v26 = vld [vmem:[%s6260_s5 + $0x168] sm:$0xff]  ;;  %v3541_v39 = vld [vmem:[%s6259_s4 + $0x170] sm:$0xff] }
 0x1a5   :  { %4555 = vmatpush3.msra.mxu1 %v3497_v42  ;;  %4524 = vmatprep.subr.mxu0 %v3482_v43  ;;  %v3555_v42 = vld [vmem:[%s6260_s5 + $0x160] sm:$0xff] }
 0x1a6   :  { %4556 = vmatprep.subr.mxu1 %v3496_v44  ;;  %4525 = vmatpush3.msra.mxu0 %v3482_v43  ;;  %v3540_v43 = vld [vmem:[%s6259_s4 + $0x168] sm:$0xff] }
 0x1a7   :  { %4557 = vmatpush3.msra.mxu1 %v3496_v44  ;;  %4526 = vmatprep.subr.mxu0 %v3481_v49  ;;  %v2386_v44 = vld [vmem:[#allocation3 + $0xc] sm:$0xff] }
 0x1a8   :  { %4558 = vmatprep.subr.mxu1 %v3495_v50  ;;  %4527 = vmatpush3.msra.mxu0 %v3481_v49  ;;  %v3539_v49 = vld [vmem:[%s6259_s4 + $0x160] sm:$0xff] }
 0x1a9   :  { %4559 = vmatpush3.msra.mxu1 %v3495_v50  ;;  %4528 = vmatprep.subr.mxu0 %v3480_v12  ;;  %v2387_v50 = vld [vmem:[#allocation3 + $0x14] sm:$0xff] }
 0x1aa   :  { %4560 = vmatprep.subr.mxu1 %v3494_v4  ;;  %4529 = vmatpush3.msra.mxu0 %v3480_v12  ;;  %v2388_v12 = vld [vmem:[#allocation3 + $0x1c] sm:$0xff] }
 0x1ab   :  { %4561 = vmatpush3.msra.mxu1 %v3494_v4  ;;  %4530 = vmatprep.subr.mxu0 %v3479_v51  ;;  %v2664_v4 = vld [vmem:[%s6262_s7 + $0x48] sm:$0xff] }
 0x1ac   :  { %4562 = vmatprep.subr.mxu1 %v3493_v54  ;;  %4531 = vmatpush3.msra.mxu0 %v3479_v51  ;;  %v3581_v51 = vld [vmem:[%s6262_s7 + $0x98] sm:$0xff] }
 0x1ad   :  { %4563 = vmatpush3.msra.mxu1 %v3493_v54  ;;  %4532 = vmatprep.subr.mxu0 %v3478_v45  ;;  %v2663_v54 = vld [vmem:[%s6262_s7 + $0x40] sm:$0xff] }
 0x1ae   :  { %4564 = vmatprep.subr.mxu1 %v3492_v48  ;;  %4533 = vmatpush3.msra.mxu0 %v3478_v45  ;;  %v3580_v45 = vld [vmem:[%s6262_s7 + $0x90] sm:$0xff] }
 0x1af   :  { %4565 = vmatpush3.msra.mxu1 %v3492_v48  ;;  %4534 = vmatprep.subr.mxu0 %v3477_v55  ;;  %v2662_v48 = vld [vmem:[%s6262_s7 + $0x38] sm:$0xff] }
 0x1b0   :  { %4566 = vmatprep.subr.mxu1 %v3491_v56  ;;  %4535 = vmatpush3.msra.mxu0 %v3477_v55  ;;  %v3579_v55 = vld [vmem:[%s6262_s7 + $0x88] sm:$0xff] }
 0x1b1   :  { %4567 = vmatpush3.msra.mxu1 %v3491_v56  ;;  %4536 = vmatprep.subr.mxu0 %v3476_v63  ;;  %v2661_v56 = vld [vmem:[%s6262_s7 + $0x30] sm:$0xff] }
 0x1b2   :  { %4569 = vmatmul.mubr.msk.f32.vlgmr.msra.gmra.mxu1 %vm1473_vm2, %v1938_v6  ;;  %4602 = vmatprep.subr.msk.mxu1 %vm1560_vm1, %v3533_v0 }
 0x1b3   :  { %4537 = vmatpush3.msra.mxu0 %v3476_v63  ;;  %4571 = vmatprep.mubr.msk.f32.mxu1 %vm1473_vm2, %v1939_v36  ;;  %v3578_v63 = vld [vmem:[%s6262_s7 + $0x80] sm:$0xff] }
 0x1b4   :  { %4603 = vmatpush3.msk.msra.mxu1 %vm1560_vm1, %v3533_v0  ;;  %4538 = vmatprep.subr.mxu0 %v3475_v8  ;;  %v2660_v0 = vld [vmem:[%s6262_s7 + $0x28] sm:$0xff] }
 0x1b5   :  { %4604 = vmatprep.subr.mxu1 %v3532_v33  ;;  %4539 = vmatpush3.msra.mxu0 %v3475_v8  ;;  %v2659_v8 = vld [vmem:[%s6262_s7 + $0x20] sm:$0xff] }
 0x1b6   :  { %4605 = vmatpush3.msra.mxu1 %v3532_v33  ;;  %4541 = vmatmul.mubr.msk.f32.vlgmr.msra.gmra.mxu0 %vm1473_vm2, %v1938_v6  ;;  %v3577_v6 = vld [vmem:[%s6262_s7 + $0x78] sm:$0xff]  ;;  %v3576_v33 = vld [vmem:[%s6262_s7 + $0x70] sm:$0xff] }
 0x1b7   :  { %4572 = vmatmul.mubr.msk.f32.gmra.mxu1 %vm1473_vm2, %v1940_v60  ;;  %4574 = vmatprep.subr.msk.mxu0 %vm1560_vm1, %v3517_v57 }
 0x1b8   :  { %4606 = vmatprep.subr.mxu1 %v3531_v7  ;;  %4543 = vmatprep.mubr.msk.f32.mxu0 %vm1473_vm2, %v1939_v36  ;;  %v2658_v36 = vld [vmem:[%s6262_s7 + $0x18] sm:$0xff] }
 0x1b9   :  { %4575 = vmatpush3.msk.msra.mxu0 %vm1560_vm1, %v3517_v57  ;;  %4607 = vmatpush3.msra.mxu1 %v3531_v7  ;;  %v3575_v57 = vld [vmem:[%s6262_s7 + $0x68] sm:$0xff]  ;;  %v2657_v7 = vld [vmem:[%s6262_s7 + $0x10] sm:$0xff] }
 0x1ba   :  { %4624 = vmatprep.mubr.msk.f32.mxu1 %vm1473_vm2, %v2161_v37  ;;  %4576 = vmatprep.subr.mxu0 %v3516_v61 }
 0x1bb   :  { %4608 = vmatprep.subr.mxu1 %v3530_v62  ;;  %4577 = vmatpush3.msra.mxu0 %v3516_v61  ;;  %v2656_v61 = vld [vmem:[%s6262_s7 + $0x8] sm:$0xff] }
 0x1bc   :  { %4609 = vmatpush3.msra.mxu1 %v3530_v62  ;;  %4544 = vmatmul.mubr.msk.f32.gmra.mxu0 %vm1473_vm2, %v1940_v60  ;;  %v3574_v60 = vld [vmem:[%s6262_s7 + $0x60] sm:$0xff]  ;;  %v3573_v62 = vld [vmem:[%s6262_s7 + $0x58] sm:$0xff] }
 0x1bd   :  { %4578 = vmatprep.subr.mxu0 %v3515_v40  ;;  %4610 = vmatprep.subr.mxu1 %v3529_v41 }
 0x1be   :  { %4579 = vmatpush3.msra.mxu0 %v3515_v40  ;;  %4596 = vmatprep.mubr.msk.f32.mxu0 %vm1473_vm2, %v2161_v37  ;;  %v2655_v37 = vld [vmem:[%s6262_s7] sm:$0xff]  ;;  %v3572_v40 = vld [vmem:[%s6262_s7 + $0x50] sm:$0xff] }
 0x1bf   :  { %4611 = vmatpush3.msra.mxu1 %v3529_v41  ;;  %4580 = vmatprep.subr.mxu0 %v3514_v46  ;;  %v6111_v41 = vld [vmem:[%s6262_s7 + $0x138] sm:$0xff] }
 0x1c0   :  { %4612 = vmatprep.subr.mxu1 %v3528_v47  ;;  %4581 = vmatpush3.msra.mxu0 %v3514_v46  ;;  %v6117_v46 = vld [vmem:[%s6262_s7 + $0xe8] sm:$0xff] }
 0x1c1   :  { %4613 = vmatpush3.msra.mxu1 %v3528_v47  ;;  %4582 = vmatprep.subr.mxu0 %v3513_v52 }
 0x1c2   :  { %4614 = vmatprep.subr.mxu1 %v3527_v53  ;;  %4583 = vmatpush3.msra.mxu0 %v3513_v52 }
 0x1c3   :  { %4615 = vmatpush3.msra.mxu1 %v3527_v53  ;;  %4584 = vmatprep.subr.mxu0 %v3512_v58 }
 0x1c4   :  { %4616 = vmatprep.subr.mxu1 %v3526_v59  ;;  %4585 = vmatpush3.msra.mxu0 %v3512_v58 }
 0x1c5   :  { %4617 = vmatpush3.msra.mxu1 %v3526_v59  ;;  %4586 = vmatprep.subr.mxu0 %v3511_v1 }
 0x1c6   :  { %4618 = vmatprep.subr.mxu1 %v3525_v2  ;;  %4587 = vmatpush3.msra.mxu0 %v3511_v1 }
 0x1c7   :  { %4619 = vmatpush3.msra.mxu1 %v3525_v2  ;;  %4588 = vmatprep.subr.mxu0 %v3510_v5 }
 0x1c8   :  { %4620 = vmatprep.subr.mxu1 %v3524_v32  ;;  %4589 = vmatpush3.msra.mxu0 %v3510_v5 }
 0x1c9   :  { %4621 = vmatpush3.msra.mxu1 %v3524_v32  ;;  %4590 = vmatprep.subr.mxu0 %v3509_v9 }
 0x1ca   :  { %4622 = vmatprep.subr.mxu1 %v3523_v10  ;;  %4591 = vmatpush3.msra.mxu0 %v3509_v9 }
 0x1cb   :  { %4623 = vmatpush3.msra.mxu1 %v3523_v10  ;;  %4592 = vmatprep.subr.mxu0 %v3508_v13 }
 0x1cc   :  { %4625 = vmatmul.mubr.msk.f32.vlgmr.msra.gmra.mxu1 %vm1473_vm2, %v2162_v15  ;;  %4658 = vmatprep.subr.msk.mxu1 %vm1560_vm1, %v3565_v14 }
 0x1cd   :  { %4593 = vmatpush3.msra.mxu0 %v3508_v13  ;;  %4627 = vmatprep.mubr.msk.f32.mxu1 %vm1473_vm2, %v2163_v18 }
 0x1ce   :  { %4659 = vmatpush3.msk.msra.mxu1 %vm1560_vm1, %v3565_v14  ;;  %4594 = vmatprep.subr.mxu0 %v3507_v16 }
 0x1cf   :  { %4660 = vmatprep.subr.mxu1 %v3564_v17  ;;  %4595 = vmatpush3.msra.mxu0 %v3507_v16 }
 0x1d0   :  { %4661 = vmatpush3.msra.mxu1 %v3564_v17  ;;  %4597 = vmatmul.mubr.msk.f32.vlgmr.msra.gmra.mxu0 %vm1473_vm2, %v2162_v15 }
 0x1d1   :  { %4628 = vmatmul.mubr.msk.f32.gmra.mxu1 %vm1473_vm2, %v2164_v3  ;;  %4630 = vmatprep.subr.msk.mxu0 %vm1560_vm1, %v3549_v19 }
 0x1d2   :  { %4662 = vmatprep.subr.mxu1 %v3563_v21  ;;  %4599 = vmatprep.mubr.msk.f32.mxu0 %vm1473_vm2, %v2163_v18 }
 0x1d3   :  { %4631 = vmatpush3.msk.msra.mxu0 %vm1560_vm1, %v3549_v19  ;;  %4663 = vmatpush3.msra.mxu1 %v3563_v21 }
 0x1d4   :  { %4680 = vmatprep.mubr.msk.f32.mxu1 %vm1473_vm2, %v2385_v20  ;;  %4632 = vmatprep.subr.mxu0 %v3548_v22 }
 0x1d5   :  { %4664 = vmatprep.subr.mxu1 %v3562_v23  ;;  %4633 = vmatpush3.msra.mxu0 %v3548_v22 }
 0x1d6   :  { %4665 = vmatpush3.msra.mxu1 %v3562_v23  ;;  %4600 = vmatmul.mubr.msk.f32.gmra.mxu0 %vm1473_vm2, %v2164_v3 }
 0x1d7   :  { %4634 = vmatprep.subr.mxu0 %v3547_v24  ;;  %4666 = vmatprep.subr.mxu1 %v3561_v25 }
 0x1d8   :  { %4635 = vmatpush3.msra.mxu0 %v3547_v24  ;;  %4652 = vmatprep.mubr.msk.f32.mxu0 %vm1473_vm2, %v2385_v20 }
 0x1d9   :  { %4667 = vmatpush3.msra.mxu1 %v3561_v25  ;;  %4636 = vmatprep.subr.mxu0 %v3546_v27 }
 0x1da   :  { %4668 = vmatprep.subr.mxu1 %v3560_v28  ;;  %4637 = vmatpush3.msra.mxu0 %v3546_v27 }
 0x1db   :  { %4669 = vmatpush3.msra.mxu1 %v3560_v28  ;;  %4638 = vmatprep.subr.mxu0 %v3545_v29 }
 0x1dc   :  { %4670 = vmatprep.subr.mxu1 %v3559_v30  ;;  %4639 = vmatpush3.msra.mxu0 %v3545_v29 }
 0x1dd   :  { %4671 = vmatpush3.msra.mxu1 %v3559_v30  ;;  %4640 = vmatprep.subr.mxu0 %v3544_v31 }
 0x1de   :  { %4672 = vmatprep.subr.mxu1 %v3558_v34  ;;  %4641 = vmatpush3.msra.mxu0 %v3544_v31 }
 0x1df   :  { %4673 = vmatpush3.msra.mxu1 %v3558_v34  ;;  %4642 = vmatprep.subr.mxu0 %v3543_v35 }
 0x1e0   :  { %4674 = vmatprep.subr.mxu1 %v3557_v38  ;;  %4643 = vmatpush3.msra.mxu0 %v3543_v35 }
 0x1e1   :  { %4675 = vmatpush3.msra.mxu1 %v3557_v38  ;;  %4644 = vmatprep.subr.mxu0 %v3542_v11 }
 0x1e2   :  { %4676 = vmatprep.subr.mxu1 %v3556_v26  ;;  %4645 = vmatpush3.msra.mxu0 %v3542_v11 }
 0x1e3   :  { %4677 = vmatpush3.msra.mxu1 %v3556_v26  ;;  %4646 = vmatprep.subr.mxu0 %v3541_v39 }
 0x1e4   :  { %4678 = vmatprep.subr.mxu1 %v3555_v42  ;;  %4647 = vmatpush3.msra.mxu0 %v3541_v39 }
 0x1e5   :  { %4679 = vmatpush3.msra.mxu1 %v3555_v42  ;;  %4648 = vmatprep.subr.mxu0 %v3540_v43 }
 0x1e6   :  { %4681 = vmatmul.mubr.msk.f32.vlgmr.msra.gmra.mxu1 %vm1473_vm2, %v2386_v44  ;;  %4649 = vmatpush3.msra.mxu0 %v3540_v43 }
 0x1e7   :  { %4683 = vmatprep.mubr.msk.f32.mxu1 %vm1473_vm2, %v2387_v50  ;;  %4650 = vmatprep.subr.mxu0 %v3539_v49 }
 0x1e8   :  { %4651 = vmatpush3.msra.mxu0 %v3539_v49  ;;  %4709 = vmatprep.subr.mxu1 %v2664_v4 }
 0x1e9   :  { %4653 = vmatmul.mubr.msk.f32.vlgmr.msra.gmra.mxu0 %vm1473_vm2, %v2386_v44  ;;  %4686 = vmatprep.subr.mxu0 %v3581_v51 }
 0x1ea   :  { %4684 = vmatmul.mubr.msk.f32.gmra.mxu1 %vm1473_vm2, %v2388_v12  ;;  %4655 = vmatprep.mubr.msk.f32.mxu0 %vm1473_vm2, %v2387_v50 }
 0x1eb   :  { %4710 = vmatpush3.msra.mxu1 %v2664_v4  ;;  %4687 = vmatpush3.msra.mxu0 %v3581_v51 }
 0x1ec   :  { %4711 = vmatprep.subr.mxu1 %v2663_v54  ;;  %4688 = vmatprep.subr.mxu0 %v3580_v45 }
 0x1ed   :  { %4656 = vmatmul.mubr.msk.f32.gmra.mxu0 %vm1473_vm2, %v2388_v12  ;;  %4712 = vmatpush3.msra.mxu1 %v2663_v54  ;;  %v3571_v54 = vld [vmem:[%s6261_s6] ss:$0 sm:$0xff] }
 0x1ee   :  { %4689 = vmatpush3.msra.mxu0 %v3580_v45  ;;  %4713 = vmatprep.subr.mxu1 %v2662_v48 }
 0x1ef   :  { %4690 = vmatprep.subr.mxu0 %v3579_v55  ;;  %4714 = vmatpush3.msra.mxu1 %v2662_v48 }
 0x1f0   :  { %4691 = vmatpush3.msra.mxu0 %v3579_v55  ;;  %4715 = vmatprep.subr.mxu1 %v2661_v56 }
 0x1f1   :  { %4692 = vmatprep.subr.mxu0 %v3578_v63  ;;  %4716 = vmatpush3.msra.mxu1 %v2661_v56 }
 0x1f2   :  { %4693 = vmatpush3.msra.mxu0 %v3578_v63  ;;  %4717 = vmatprep.subr.mxu1 %v2660_v0 }
 0x1f3   :  { %4694 = vmatprep.subr.mxu0 %v3577_v6  ;;  %4718 = vmatpush3.msra.mxu1 %v2660_v0 }
 0x1f4   :  { %4695 = vmatpush3.msra.mxu0 %v3577_v6  ;;  %4719 = vmatprep.subr.mxu1 %v2659_v8 }
 0x1f5   :  { %4696 = vmatprep.subr.mxu0 %v3576_v33  ;;  %4720 = vmatpush3.msra.mxu1 %v2659_v8 }
 0x1f6   :  { %4697 = vmatpush3.msra.mxu0 %v3576_v33  ;;  %4721 = vmatprep.subr.mxu1 %v2658_v36 }
 0x1f7   :  { %4698 = vmatprep.subr.mxu0 %v3575_v57  ;;  %4722 = vmatpush3.msra.mxu1 %v2658_v36 }
 0x1f8   :  { %4699 = vmatpush3.msra.mxu0 %v3575_v57  ;;  %4723 = vmatprep.subr.mxu1 %v2657_v7 }
 0x1f9   :  { %4700 = vmatprep.subr.mxu0 %v3574_v60  ;;  %4724 = vmatpush3.msra.mxu1 %v2657_v7 }
 0x1fa   :  { %4701 = vmatpush3.msra.mxu0 %v3574_v60  ;;  %4725 = vmatprep.subr.mxu1 %v2656_v61 }
 0x1fb   :  { %4702 = vmatprep.subr.mxu0 %v3573_v62  ;;  %4726 = vmatpush3.msra.mxu1 %v2656_v61 }
 0x1fc   :  { %4703 = vmatpush3.msra.mxu0 %v3573_v62  ;;  %4727 = vmatprep.subr.mxu1 %v2655_v37 }
 0x1fd   :  { %4704 = vmatprep.subr.mxu0 %v3572_v40  ;;  %4728 = vmatpush3.msra.mxu1 %v2655_v37 }
 0x1fe   :  { %4705 = vmatpush3.msra.mxu0 %v3572_v40  ;;  %4755 = vmatprep.subr.mxu1 %v6111_v41 }
 0x1ff   :  { %4732 = vmatprep.subr.mxu0 %v6117_v46 }
 0x23f   :  { %v4458_v47 = vpop.f32.mrf.mxu1 }
 0x241   :  { %v1730_v53 = vpop.f32.mrf.mxu1 }
 0x242   :  { %v4430_v52 = vpop.f32.mrf.mxu0 }
 0x243   :  { %v1736_v26 = vadd.f32 %v4458_v47, %v4430_v52 }
 0x244   :  { %v1630_v58 = vpop.f32.mrf.mxu0 }
 0x245   :  { %v1731_v44 = vadd.f32 %v1730_v53, %v1630_v58 }
 0x248   :  { %v4461_v59 = vpop.f32.mrf.mxu1 }
 0x24a   :  { %v4433_v1 = vpop.f32.mrf.mxu0  ;;  %v1740_v2 = vpop.f32.mrf.mxu1 }
 0x24b   :  { %v1746_v45 = vadd.f32 %v4461_v59, %v4433_v1 }
 0x24c   :  { %v1640_v32 = vpop.f32.mrf.mxu0 }
 0x24d   :  { %v1741_v33 = vadd.f32 %v1740_v2, %v1640_v32 }
 0x258   :  { %v4514_v5 = vpop.f32.mrf.mxu1 }
 0x25a   :  { %v1918_v9 = vpop.f32.mrf.mxu1 }
 0x25c   :  { %v4486_v10 = vpop.f32.mrf.mxu0 }
 0x25d   :  { %v4517_v13 = vpop.f32.mrf.mxu1  ;;  %v1924_v31 = vadd.f32 %v4514_v5, %v4486_v10 }
 0x25e   :  { %v1830_v14 = vpop.f32.mrf.mxu0 }
 0x25f   :  { %v1928_v15 = vpop.f32.mrf.mxu1  ;;  %v1919_v34 = vadd.f32 %v1918_v9, %v1830_v14 }
 0x262   :  { %v4489_v16 = vpop.f32.mrf.mxu0 }
 0x263   :  { %v1934_v39 = vadd.f32 %v4517_v13, %v4489_v16 }
 0x264   :  { %v1840_v18 = vpop.f32.mrf.mxu0 }
 0x265   :  { %v1929_v48 = vadd.f32 %v1928_v15, %v1840_v18 }
 0x272   :  { %v4570_v17 = vpop.f32.mrf.mxu1 }
 0x273   :  { %v2158_v35 = vadd.f32 %v4570_v17, %v1924_v31 }
 0x274   :  { %v2138_v19 = vpop.f32.mrf.mxu1 }
 0x275   :  { %v2157_v42 = vadd.f32 %v2138_v19, %v1919_v34 }
 0x276   :  { %v4542_v21 = vpop.f32.mrf.mxu0 }
 0x277   :  { %v4573_v3 = vpop.f32.mrf.mxu1  ;;  %v2054_v50 = vadd.f32 %v4542_v21, %v1736_v26 }
 0x278   :  { %v2034_v22 = vpop.f32.mrf.mxu0  ;;  %v2160_v12 = vadd.f32 %v4573_v3, %v1934_v39 }
 0x279   :  { %v2148_v23 = vpop.f32.mrf.mxu1  ;;  %v2053_v63 = vadd.f32 %v2034_v22, %v1731_v44  ;;  %v3606_v44 = vld [vmem:[%s6262_s7 + $0x130] sm:$0xff] }
 0x27a   :  { %v2159_v36 = vadd.f32 %v2148_v23, %v1929_v48  ;;  %v3593_v48 = vld [vmem:[%s6262_s7 + $0xd8] sm:$0xff] }
 0x27c   :  { %v4545_v20 = vpop.f32.mrf.mxu0 }
 0x27d   :  { %v2056_v61 = vadd.f32 %v4545_v20, %v1746_v45 }
 0x27e   :  { %v2044_v25 = vpop.f32.mrf.mxu0 }
 0x27f   :  { %v2055_v47 = vadd.f32 %v2044_v25, %v1741_v33  ;;  %v3600_v33 = vld [vmem:[%s6262_s7 + $0x100] sm:$0xff] }
 0x28c   :  { %v4626_v24 = vpop.f32.mrf.mxu1 }
 0x28d   :  { %v2382_v43 = vadd.f32 %v4626_v24, %v2158_v35 }
 0x28e   :  { %v2362_v27 = vpop.f32.mrf.mxu1 }
 0x28f   :  { %v2381_v4 = vadd.f32 %v2362_v27, %v2157_v42 }
 0x290   :  { %v4598_v28 = vpop.f32.mrf.mxu0 }
 0x291   :  { %v4629_v29 = vpop.f32.mrf.mxu1  ;;  %v2278_v0 = vadd.f32 %v4598_v28, %v2054_v50 }
 0x292   :  { %v2258_v30 = vpop.f32.mrf.mxu0  ;;  %v2384_v6 = vadd.f32 %v4629_v29, %v2160_v12 }
 0x293   :  { %v2372_v38 = vpop.f32.mrf.mxu1  ;;  %v2277_v62 = vadd.f32 %v2258_v30, %v2053_v63  ;;  %v3602_v63 = vld [vmem:[%s6262_s7 + $0x110] sm:$0xff] }
 0x294   :  { %v2383_v52 = vadd.f32 %v2372_v38, %v2159_v36  ;;  %v3588_v36 = vld [vmem:[%s6262_s7 + $0xb0] sm:$0xff] }
 0x296   :  { %v4601_v11 = vpop.f32.mrf.mxu0 }
 0x297   :  { %v2280_v1 = vadd.f32 %v4601_v11, %v2056_v61  ;;  %v3586_v61 = vld [vmem:[%s6262_s7 + $0xa0] sm:$0xff] }
 0x298   :  { %v2268_v55 = vpop.f32.mrf.mxu0 }
 0x299   :  { %v2279_v10 = vadd.f32 %v2268_v55, %v2055_v47  ;;  %v3603_v55 = vld [vmem:[%s6262_s7 + $0x118] sm:$0xff]  ;;  %v3618_v47 = vld [vmem:[%s6262_s7 + $0x180] sm:$0xff] }
 0x2a6   :  { %v4682_v49 = vpop.f32.mrf.mxu1 }
 0x2a7   :  { %v2606_v51 = vadd.f32 %v4682_v49, %v2382_v43 }
 0x2a8   :  { %v2586_v56 = vpop.f32.mrf.mxu1 }
 0x2a9   :  { %v2605_v8 = vadd.f32 %v2586_v56, %v2381_v4  ;;  %v2625_v57 = vadd.f32 %v3571_v54, %v2606_v51  ;;  %v4654_v7 = vpop.f32.mrf.mxu0  ;;  %v3594_v51 = vld [vmem:[%s6262_s7 + $0xe0] sm:$0xff]  ;;  %v3591_v56 = vld [vmem:[%s6262_s7 + $0xc8] sm:$0xff] }
 0x2aa   :  { %v4685_v60 = vpop.f32.mrf.mxu1  ;;  %v2502_v37 = vadd.f32 %v4654_v7, %v2278_v0  ;;  %v3590_v0 = vld [vmem:[%s6262_s7 + $0xc0] sm:$0xff]  ;;  %v3587_v7 = vld [vmem:[%s6262_s7 + $0xa8] sm:$0xff] }
 0x2ab   :  { %v2608_v40 = vadd.f32 %v4685_v60, %v2384_v6  ;;  %v2624_v53 = vadd.f32 %v3571_v54, %v2605_v8  ;;  %v2482_v58 = vpop.f32.mrf.mxu0  ;;  %v2629_v13 = vmax.f32 %v2625_v57, 0.0  ;;  %v3601_v6 = vld [vmem:[%s6262_s7 + $0x108] sm:$0xff]  ;;  %v3589_v8 = vld [vmem:[%s6262_s7 + $0xb8] sm:$0xff]  ;;  %v3598_v60 = vld [vmem:[%s6262_s7 + $0xf0] sm:$0xff] }
 0x2ac   :  { %v2596_v59 = vpop.f32.mrf.mxu1  ;;  %v2617_v5 = vadd.f32 %v3571_v54, %v2502_v37  ;;  %v2501_v9 = vadd.f32 %v2482_v58, %v2277_v62  ;;  %v3599_v57 = vld [vmem:[%s6262_s7 + $0xf8] sm:$0xff]  ;;  %v3619_v62 = vld [vmem:[%s6262_s7 + $0x188] sm:$0xff]  ;;  %v3616_v58 = vld [vmem:[%s6262_s7 + $0x170] sm:$0xff] }
 0x2ad   :  { %v2607_v14 = vadd.f32 %v2596_v59, %v2383_v52  ;;  %v4657_v2 = vpop.f32.mrf.mxu0  ;;  %v2627_v15 = vadd.f32 %v3571_v54, %v2608_v40  ;;  %v2628_v18 = vmax.f32 %v2624_v53, 0.0  ;;  %v3617_v53 = vld [vmem:[%s6262_s7 + $0x178] sm:$0xff]  ;;  %v3615_v59 = vld [vmem:[%s6262_s7 + $0x168] sm:$0xff] }
 0x2ae   :  { %v2621_v32 = vmax.f32 %v2617_v5, 0.0  ;;  %v2616_v16 = vadd.f32 %v3571_v54, %v2501_v9  ;;  %v2504_v17 = vadd.f32 %v4657_v2, %v2280_v1  ;;  %v3614_v1 = vld [vmem:[%s6262_s7 + $0x160] sm:$0xff]  ;;  %v3613_v5 = vld [vmem:[%s6262_s7 + $0x158] sm:$0xff]  ;;  %v3612_v9 = vld [vmem:[%s6262_s7 + $0x150] sm:$0xff] }
 0x2af   :  { %v2626_v19 = vadd.f32 %v3571_v54, %v2607_v14  ;;  %v2492_v21 = vpop.f32.mrf.mxu0  ;;  %v2631_v24 = vmax.f32 %v2627_v15, 0.0  ;;  %v3145_v2 = vld [vmem:[%s6264_s9 + $0x30] sm:$0x3]  ;;  %v3143_v15 = vld [vmem:[%s6264_s9 + $0x20] sm:$0xff] }
 0x2b0   :  { %v2633_v3 = vmax.f32 %v2621_v32, %v2629_v13  ;;  %v2620_v22 = vmax.f32 %v2616_v16, 0.0  ;;  %v2619_v23 = vadd.f32 %v3571_v54, %v2504_v17  ;;  %v2503_v20 = vadd.f32 %v2492_v21, %v2279_v10  ;;  %v3611_v10 = vld [vmem:[%s6262_s7 + $0x148] sm:$0xff]  ;;  %v3610_v13 = vld [vmem:[%s6262_s7 + $0x140] sm:$0xff]  ;;  %v3142_v16 = vld [vmem:[%s6264_s9 + $0x18] sm:$0xff] }
 0x2b1   :  { %v2630_v29 = vmax.f32 %v2626_v19, 0.0  ;;  %v3144_v32 = vld [vmem:[%s6264_s9 + $0x28] sm:$0xff]  ;;  %v3141_v17 = vld [vmem:[%s6264_s9 + $0x10] sm:$0xff]  ;;  %v3139_v19 = vld [vmem:[%s6264_s9] sm:$0xff] }
 0x2b2   :  { %2638 = vst.msk [vmem:[#allocation4 + $0x8] sm:$0xff] %vm2636_vm3, %v2633_v3  ;;  %v2632_v25 = vmax.f32 %v2620_v22, %v2628_v18  ;;  %v2623_v27 = vmax.f32 %v2619_v23, 0.0  ;;  %v2618_v28 = vadd.f32 %v3571_v54, %v2503_v20  ;;  %v3605_v54 = vld [vmem:[%s6262_s7 + $0x128] sm:$0xff] }
 0x2b3   :  { %v3140_v18 = vld [vmem:[%s6264_s9 + $0x8] sm:$0xff] }
 0x2b4   :  { %2637 = vst.msk [vmem:[#allocation4] sm:$0xff] %vm2636_vm3, %v2632_v25  ;;  %v2635_v30 = vmax.f32 %v2623_v27, %v2631_v24  ;;  %v2622_v31 = vmax.f32 %v2618_v28, 0.0 }
 0x2b6   :  { %2640 = vst.msk [vmem:[#allocation4 + $0x18] sm:$0xff] %vm2636_vm3, %v2635_v30  ;;  %v2634_v34 = vmax.f32 %v2622_v31, %v2630_v29 }
 0x2b8   :  { %2639 = vst.msk [vmem:[#allocation4 + $0x10] sm:$0xff] %vm2636_vm3, %v2634_v34 }
 0x2bb   :  { %v2641_v35 = vld [vmem:[#allocation4] ss:$2 sm:$0xff]  ;;  %v2645_v38 = vld [vmem:[#allocation4 + $0x1] ss:$2 sm:$0xff] }
 0x2bc   :  { %v2648_v11 = vmax.f32 %v2641_v35, %v2645_v38 }
 0x2be   :  { %2650 = vst.msk [vmem:[#allocation5] sm:$0xff] %vm2636_vm3, %v2648_v11  ;;  %v3622_v11 = vld [vmem:[%s6263_s8] ss:$0 sm:$0xff]  ;;  %s4820_s8 = scalar_lea.vmem %s3249_s18, 32 }
 0x2bf   :  { %v2643_v26 = vld [vmem:[#allocation4 + $0x10] ss:$2 sm:$0xff]  ;;  %v2647_v39 = vld [vmem:[#allocation4 + $0x11] ss:$2 sm:$0xff]  ;;  %p4821_p0 = scmp.ne.s32.totalorder %s3249_s18, %s4820_s8  ;;  %p4826_p2 = scmp.lt.s32.totalorder %s4820_s8, %s4820_s8 }
 0x2c0   :  { %v2649_v42 = vmax.f32 %v2643_v26, %v2647_v39 }
 0x2c1   :  { %p4827_p3 = por %p4826_p2, %p4825_p1 }
 0x2c2   :  { %2651 = vst.msk [vmem:[#allocation5 + $0x8] sm:$0xff] %vm2636_vm3, %v2649_v42 }
 0x2c3   :  { %p4828_p4 = pnand %p4827_p3, %p4821_p0 }
 0x2c5   :  { %v2653_v43 = vld [vmem:[#allocation5] sm:$0xff] }
 0x2c6   :  { %4729 = vmatprep.mubr.msk.f32.mxu1 %vm2636_vm3, %v2653_v43 }
 0x2c9   :  { %v2665_v49 = vld [vmem:[#allocation5 + $0x1] sm:$0xff]  ;;  %v2666_v12 = vld [vmem:[#allocation5 + $0x9] sm:$0xff] }
 0x2ca   :  { %v2654_v50 = vld [vmem:[#allocation5 + $0x8] sm:$0xff]  ;;  %4706 = vmatprep.mubr.msk.f32.mxu0 %vm2636_vm3, %v2665_v49 }
 0x2cb   :  { %4730 = vmatmul.mubr.msk.f32.vlgmr.msra.gmra.mxu1 %vm2636_vm3, %v2654_v50  ;;  %v2936_v4 = vld [vmem:[#allocation5 + $0x3] sm:$0xff]  ;;  %4707 = vmatmul.mubr.msk.f32.vlgmr.msra.gmra.mxu0 %vm2636_vm3, %v2666_v12  ;;  %v2937_v37 = vld [vmem:[#allocation5 + $0xb] sm:$0xff]  ;;  %v3623_v12 = vld [vmem:[%s6265_s10] ss:$0 sm:$0xff] }
 0x2cc   :  { %4756 = vmatpush3.msra.mxu1 %v6111_v41  ;;  %4733 = vmatpush3.msra.mxu0 %v6117_v46  ;;  %v2840_v45 = vld [vmem:[#allocation5 + $0x2] sm:$0xff]  ;;  %v3604_v41 = vld [vmem:[%s6262_s7 + $0x120] sm:$0xff]  ;;  %v2841_v40 = vld [vmem:[#allocation5 + $0xa] sm:$0xff] }
 0x2cd   :  { %4757 = vmatprep.subr.mxu1 %v3606_v44  ;;  %4775 = vmatprep.mubr.msk.f32.mxu1 %vm2636_vm3, %v2936_v4  ;;  %v3592_v46 = vld [vmem:[%s6262_s7 + $0xd0] sm:$0xff] }
 0x2ce   :  { %4734 = vmatprep.subr.mxu0 %v3594_v51  ;;  %4752 = vmatprep.mubr.msk.f32.mxu0 %vm2636_vm3, %v2840_v45  ;;  %v3032_v52 = vld [vmem:[#allocation5 + $0x4] sm:$0xff]  ;;  %v3033_v14 = vld [vmem:[#allocation5 + $0xc] sm:$0xff] }
 0x2cf   :  { %4758 = vmatpush3.msra.mxu1 %v3606_v44  ;;  %4735 = vmatpush3.msra.mxu0 %v3594_v51 }
 0x2d0   :  { %4759 = vmatprep.subr.mxu1 %v3605_v54  ;;  %4736 = vmatprep.subr.mxu0 %v3593_v48 }
 0x2d1   :  { %4760 = vmatpush3.msra.mxu1 %v3605_v54  ;;  %4737 = vmatpush3.msra.mxu0 %v3593_v48 }
 0x2d2   :  { %4761 = vmatprep.subr.mxu1 %v3604_v41  ;;  %4738 = vmatprep.subr.mxu0 %v3592_v46 }
 0x2d3   :  { %4762 = vmatpush3.msra.mxu1 %v3604_v41  ;;  %4739 = vmatpush3.msra.mxu0 %v3592_v46 }
 0x2d4   :  { %4763 = vmatprep.subr.mxu1 %v3603_v55  ;;  %4740 = vmatprep.subr.mxu0 %v3591_v56 }
 0x2d5   :  { %4764 = vmatpush3.msra.mxu1 %v3603_v55  ;;  %4741 = vmatpush3.msra.mxu0 %v3591_v56 }
 0x2d6   :  { %4765 = vmatprep.subr.mxu1 %v3602_v63  ;;  %4742 = vmatprep.subr.mxu0 %v3590_v0 }
 0x2d7   :  { %4766 = vmatpush3.msra.mxu1 %v3602_v63  ;;  %4743 = vmatpush3.msra.mxu0 %v3590_v0 }
 0x2d8   :  { %4767 = vmatprep.subr.mxu1 %v3601_v6  ;;  %4744 = vmatprep.subr.mxu0 %v3589_v8 }
 0x2d9   :  { %4768 = vmatpush3.msra.mxu1 %v3601_v6  ;;  %4745 = vmatpush3.msra.mxu0 %v3589_v8 }
 0x2da   :  { %4769 = vmatprep.subr.mxu1 %v3600_v33  ;;  %4746 = vmatprep.subr.mxu0 %v3588_v36 }
 0x2db   :  { %4770 = vmatpush3.msra.mxu1 %v3600_v33  ;;  %4747 = vmatpush3.msra.mxu0 %v3588_v36 }
 0x2dc   :  { %4771 = vmatprep.subr.mxu1 %v3599_v57  ;;  %4748 = vmatprep.subr.mxu0 %v3587_v7 }
 0x2dd   :  { %4772 = vmatpush3.msra.mxu1 %v3599_v57  ;;  %4749 = vmatpush3.msra.mxu0 %v3587_v7 }
 0x2de   :  { %4773 = vmatprep.subr.mxu1 %v3598_v60  ;;  %4750 = vmatprep.subr.mxu0 %v3586_v61 }
 0x2df   :  { %4774 = vmatpush3.msra.mxu1 %v3598_v60  ;;  %4751 = vmatpush3.msra.mxu0 %v3586_v61 }
 0x2e0   :  { %4776 = vmatmul.mubr.msk.f32.vlgmr.msra.gmra.mxu1 %vm2636_vm3, %v2937_v37  ;;  %4753 = vmatmul.mubr.msk.f32.vlgmr.msra.gmra.mxu0 %vm2636_vm3, %v2841_v40 }
 0x2e1   :  { %4778 = vmatprep.subr.mxu0 %v3619_v62  ;;  %4798 = vmatprep.mubr.msk.f32.mxu0 %vm2636_vm3, %v3032_v52 }
 0x2e2   :  { %4779 = vmatpush3.msra.mxu0 %v3619_v62  ;;  %4801 = vmatprep.subr.msk.mxu1 %vm3160_vm4, %v3145_v2 }
 0x2e3   :  { %4780 = vmatprep.subr.mxu0 %v3618_v47  ;;  %4802 = vmatpush3.msk.msra.mxu1 %vm3160_vm4, %v3145_v2 }
 0x2e4   :  { %4781 = vmatpush3.msra.mxu0 %v3618_v47  ;;  %4803 = vmatprep.subr.mxu1 %v3144_v32 }
 0x2e5   :  { %4782 = vmatprep.subr.mxu0 %v3617_v53  ;;  %4804 = vmatpush3.msra.mxu1 %v3144_v32 }
 0x2e6   :  { %4783 = vmatpush3.msra.mxu0 %v3617_v53  ;;  %4805 = vmatprep.subr.mxu1 %v3143_v15 }
 0x2e7   :  { %4784 = vmatprep.subr.mxu0 %v3616_v58  ;;  %4806 = vmatpush3.msra.mxu1 %v3143_v15 }
 0x2e8   :  { %4785 = vmatpush3.msra.mxu0 %v3616_v58  ;;  %4807 = vmatprep.subr.mxu1 %v3142_v16 }
 0x2e9   :  { %4786 = vmatprep.subr.mxu0 %v3615_v59  ;;  %4808 = vmatpush3.msra.mxu1 %v3142_v16 }
 0x2ea   :  { %4787 = vmatpush3.msra.mxu0 %v3615_v59  ;;  %4809 = vmatprep.subr.mxu1 %v3141_v17 }
 0x2eb   :  { %4788 = vmatprep.subr.mxu0 %v3614_v1  ;;  %4810 = vmatpush3.msra.mxu1 %v3141_v17 }
 0x2ec   :  { %4789 = vmatpush3.msra.mxu0 %v3614_v1  ;;  %4811 = vmatprep.subr.mxu1 %v3140_v18 }
 0x2ed   :  { %4790 = vmatprep.subr.mxu0 %v3613_v5  ;;  %4812 = vmatpush3.msra.mxu1 %v3140_v18 }
 0x2ee   :  { %4791 = vmatpush3.msra.mxu0 %v3613_v5  ;;  %4813 = vmatprep.subr.mxu1 %v3139_v19 }
 0x2ef   :  { %4792 = vmatprep.subr.mxu0 %v3612_v9  ;;  %4814 = vmatpush3.msra.mxu1 %v3139_v19 }
 0x2f0   :  { %4793 = vmatpush3.msra.mxu0 %v3612_v9 }
 0x2f1   :  { %4794 = vmatprep.subr.mxu0 %v3611_v10 }
 0x2f2   :  { %4795 = vmatpush3.msra.mxu0 %v3611_v10 }
 0x2f3   :  { %4796 = vmatprep.subr.mxu0 %v3610_v13 }
 0x2f4   :  { %4797 = vmatpush3.msra.mxu0 %v3610_v13 }
 0x2f5   :  { %4799 = vmatmul.mubr.msk.f32.vlgmr.msra.gmra.mxu0 %vm2636_vm3, %v3033_v14 }
 0x38b   :  { %v4708_v21 = vpop.f32.mrf.mxu0  ;;  %v4731_v3 = vpop.f32.mrf.mxu1 }
 0x38c   :  { %v2837_v24 = vadd.f32 %v4731_v3, %v4708_v21 }
 0x38d   :  { %v2750_v22 = vpop.f32.mrf.mxu0  ;;  %v2831_v20 = vpop.f32.mrf.mxu1 }
 0x38e   :  { %v2832_v27 = vadd.f32 %v2831_v20, %v2750_v22 }
 0x3a0   :  { %v4754_v23 = vpop.f32.mrf.mxu0  ;;  %v4777_v29 = vpop.f32.mrf.mxu1 }
 0x3a1   :  { %v2935_v28 = vadd.f32 %v4754_v23, %v2837_v24 }
 0x3a2   :  { %v2925_v25 = vpop.f32.mrf.mxu0  ;;  %v3021_v34 = vpop.f32.mrf.mxu1 }
 0x3a3   :  { %v2934_v30 = vadd.f32 %v2925_v25, %v2832_v27  ;;  %v3031_v31 = vadd.f32 %v4777_v29, %v2935_v28 }
 0x3a5   :  { %v3030_v26 = vadd.f32 %v3021_v34, %v2934_v30 }
 0x3b5   :  { %v4800_v35 = vpop.f32.mrf.mxu0 }
 0x3b6   :  { %v3127_v38 = vadd.f32 %v4800_v35, %v3031_v31 }
 0x3b7   :  { %v3117_v39 = vpop.f32.mrf.mxu0 }
 0x3b8   :  { %v3126_v42 = vadd.f32 %v3117_v39, %v3030_v26  ;;  %v3136_v43 = vadd.f32 %v3622_v11, %v3127_v38 }
 0x3ba   :  { %v3135_v44 = vadd.f32 %v3622_v11, %v3126_v42  ;;  %v3138_v50 = vmax.f32 %v3136_v43, 0.0 }
 0x3bc   :  { %v3137_v49 = vmax.f32 %v3135_v44, 0.0 }
 0x3be   :  { %4815 = vmatprep.mubr.msk.f32.mxu1 %vm3153_vm5, %v3137_v49 }
 0x3bf   :  { %4816 = vmatmul.mubr.msk.f32.vlgmr.msra.gmra.mxu1 %vm3153_vm5, %v3138_v50 }
 0x47f   :  { %v4817_v4 = vpop.f32.mrf.mxu1 }
 0x480   :  { %v3236_v51 = vadd.f32 %v4817_v4, %v3623_v12 }
 0x481   :  { %v3230_v54 = vpop.f32.mrf.mxu1 }
 0x482   :  { %3241 = vst.msk [vmem:[#allocation6 + $0x1] sm:$0x1] %vm3239_vm6, %v3236_v51  ;;  %v3231_v45 = vadd.f32 %v3623_v12, %v3230_v54 }
 0x484   :  { %3240 = vst.msk [vmem:[#allocation6] sm:$0x1] %vm3239_vm6, %v3231_v45 }
 0x485   :  { %4831 = shalt.err (!%p4828_p4)
}
 0x486   :  { %3251 = dma.vmem_to_hbm [thread:$0]  %s3249_s18, 32, %s6266_s11, [#allocation7]  }
 0x487   :  { %4840 = dma.done.wait [#allocation7], 32  }
 0x488   :  { %4841 = vsyncadd [#allocation7], 4294967264 }
 0x489   :  { %3255 = vsyncpa [#allocation7], 1 }

</bundles_post_ra>
